<compile_context>
chip_gen: v7x
topology: tpu7x:2x2x1
jax: 0.10.0
libtpu: 0.0.40
codegen_flags: <defaults>
</compile_context>

<pallas_src>
import jax
import jax.numpy as jnp
from jax.experimental import pallas as pl
from jax.experimental.pallas import tpu as pltpu

# ---- problem configuration (hard-coded for this module instance) ------------
C_IN = 4                      # in_channel
H = W = 16                    # input spatial size
HW = H * W                    # 256
HP = H + 2                    # 18  (3x3-conv padded side)
NPAD = HP * HP                # 324 (padded-flat spatial layout length)
MARGIN = HP + 1               # 19  (max |tap offset| of a 3x3 conv on this layout)
PAD_SCR = 384                 # >= NPAD + 2 * MARGIN
LEAKY = 0.1
OUT_HW = 256                  # AdaptiveAvgPool2d(256)
UPS = OUT_HW // H             # 16x replication factor


# ----------------------------- Pallas kernel ---------------------------------
def _idn_kernel(x_ref, ring_ref, col1_ref, w1_ref, b1_ref, m2_ref, b2_ref,
                wst_ref, bst_ref, wc1_ref, bc1_ref, wc2_ref, bc2_ref,
                content_ref, style_ref, pad_ref, col_ref):
    f32 = jnp.float32

    def lrelu(v):
        return jnp.where(v > 0, v, LEAKY * v)

    # ---------------- style_mu path (two 4x4/s2 convs + global avg pool) -----
    col1 = col1_ref[0]                                                 # (64, 64)
    h1 = lrelu(jnp.dot(w1_ref[...], col1, preferred_element_type=f32)
               + b1_ref[...])                                          # (4, 64)

    # second conv: gather+weights folded into per-input-channel matrices,
    # output lanes ordered (co*16 + 4*oh + ow).
    z2 = b2_ref[...]                                                   # (1, 64)
    for ci in range(C_IN):
        z2 = z2 + jnp.dot(h1[ci:ci + 1, :], m2_ref[ci],
                          preferred_element_type=f32)
    a2 = lrelu(z2)                                                     # (1, 64)

    # AdaptiveAvgPool2d(1): per-channel mean over the 4x4 map -> column (4,1).
    i4 = jax.lax.broadcasted_iota(jnp.int32, (C_IN, 1), 0)
    mu_col = jnp.zeros((C_IN, 1), f32)
    for c in range(C_IN):
        m_c = jnp.mean(a2[:, 16 * c:16 * (c + 1)], axis=1, keepdims=True)
        mu_col = jnp.where(i4 == c, m_c, mu_col)

    # ---------------- instance statistics ------------------------------------
    x = x_ref[0]                                                       # (4, 324)
    ring = ring_ref[...]                                               # (1, 324)
    ring_b = ring > 0.5

    mean_feat = jnp.sum(x, axis=1, keepdims=True) * (1.0 / HW)         # (4, 1)
    dev = jnp.where(ring_b, x - mean_feat, 0.0)
    var = jnp.sum(dev * dev, axis=1, keepdims=True) * (1.0 / (HW - 1))
    sigma_col = jnp.sqrt(var)                                          # (4, 1)

    # ---------------- style head: Linear(2C -> style_dim), column form -------
    style_col = (jnp.dot(wst_ref[:, 0:C_IN], mu_col,
                         preferred_element_type=f32)
                 + jnp.dot(wst_ref[:, C_IN:2 * C_IN], sigma_col,
                           preferred_element_type=f32)
                 + bst_ref[...])                                       # (32, 1)
    style_ref[0] = style_col.astype(style_ref.dtype)

    # ---------------- content path: two 3x3 convs on padded-flat layout ------
    xc = jnp.where(ring_b, (x - mu_col) / sigma_col, 0.0)              # (4, 324)

    def conv3x3(src, wmat, bias):
        # src: (C_IN, NPAD) on the padded-flat layout, pad ring already zero.
        pad_ref[:, MARGIN:MARGIN + NPAD] = src
        t = 0
        for dh in range(3):
            for dw in range(3):
                off = (dh - 1) * HP + (dw - 1)
                col_ref[C_IN * t:C_IN * (t + 1), :] = (
                    pad_ref[:, MARGIN + off:MARGIN + off + NPAD])
                t += 1
        return jnp.dot(wmat, col_ref[...], preferred_element_type=f32) + bias

    cc1 = jnp.where(ring_b,
                    lrelu(conv3x3(xc, wc1_ref[...], bc1_ref[...])), 0.0)
    cc2 = lrelu(conv3x3(cc1, wc2_ref[...], bc2_ref[...]))              # (1, 324)

    # ---------------- AdaptiveAvgPool2d(256) == 16x replication --------------
    # Gather the 16x16 valid map, expand columns with one matmul, replicate
    # rows with lane-dense (16, 256) stores.
    row_i = jax.lax.broadcasted_iota(jnp.int32, (H, W), 0)
    c2mat = jnp.zeros((H, W), f32)
    for a in range(H):
        base = (a + 1) * HP + 1
        c2mat = jnp.where(row_i == a, cc2[:, base:base + W], c2mat)

    b_iota = jax.lax.broadcasted_iota(jnp.int32, (W, OUT_HW), 0)
    j_iota = jax.lax.broadcasted_iota(jnp.int32, (W, OUT_HW), 1)
    rt = ((j_iota >= UPS * b_iota) & (j_iota < UPS * b_iota + UPS)).astype(f32)
    tmp = jnp.dot(c2mat, rt, preferred_element_type=f32)               # (16, 256)

    for a in range(H):
        content_ref[0, UPS * a:UPS * (a + 1), :] = jnp.broadcast_to(
            tmp[a:a + 1, :], (UPS, OUT_HW)).astype(content_ref.dtype)


# ----------------------------- wrapper-side helpers ---------------------------
def _ring_mask():
    v = (jnp.arange(HP) >= 1) & (jnp.arange(HP) <= H)
    m = v[:, None] & v[None, :]
    return m.reshape(1, NPAD).astype(jnp.float32)


def _im2col_s2_k4(xpad):
    """(B, C, 18, 18) padded input -> (B, C*16, 64) im2col for a 4x4/stride-2
    conv; rows ordered ci*16 + 4*kh + kw, cols ordered 8*oh + ow."""
    b, c = xpad.shape[0], xpad.shape[1]
    pieces = []
    for kh in range(4):
        for kw in range(4):
            patch = xpad[:, :, kh:kh + 15:2, kw:kw + 15:2]             # (B,C,8,8)
            pieces.append(patch.reshape(b, c, 64))
    col = jnp.stack(pieces, axis=2)                                    # (B,C,16,64)
    return col.reshape(b, c * 16, 64)


def _build_m2(w2):
    """Fold the second 4x4/s2/p1 conv (weights + input gather) into per-input-
    channel matrices M2[ci, 8*ih+iw, 16*co+4*oh+ow]."""
    c_out, c_in = w2.shape[0], w2.shape[1]
    ih = jnp.arange(8)
    oh = jnp.arange(4)
    k = ih[:, None] - 2 * oh[None, :] + 1                              # (8, 4)
    valid = (k >= 0) & (k < 4)
    kc = jnp.clip(k, 0, 3)
    t = w2[:, :, kc[:, :, None, None], kc[None, None, :, :]]           # (co,ci,ih,oh,iw,ow)
    t = t * (valid[:, :, None, None] & valid[None, None, :, :])
    t = jnp.transpose(t, (1, 2, 4, 0, 3, 5))                           # (ci,ih,iw,co,oh,ow)
    return t.reshape(c_in, 64, c_out * 16)


def idn_layer_forward(feat, params):
    """feat: (B, 4, 16, 16) NCHW float32.  Returns (content (B,1,256,256),
    style (B, style_dim))."""
    (w1, b1, w2, b2, wst, bst, wc1, bc1, wc2, bc2) = params
    B = feat.shape[0]
    style_dim = wst.shape[0]
    assert feat.shape[1:] == (C_IN, H, W)

    x = feat.astype(jnp.float32)
    xpad = jnp.pad(x, ((0, 0), (0, 0), (1, 1), (1, 1)))                # (B,4,18,18)
    xflat = xpad.reshape(B, C_IN, NPAD)                                # lane-dense spatial

    col1 = _im2col_s2_k4(xpad)                                         # (B,64,64)
    ring = _ring_mask()                                                # (1,324)

    # weight preprocessing (pure reshapes / scatters of the given weights)
    w1mat = w1.reshape(C_IN, C_IN * 16).astype(jnp.float32)
    b1col = b1.reshape(C_IN, 1).astype(jnp.float32)
    m2 = _build_m2(w2.astype(jnp.float32))                             # (4,64,64)
    b2rep = jnp.repeat(b2.astype(jnp.float32), 16)[None, :]            # (1,64)
    wstm = wst.astype(jnp.float32)                                     # (32,8)
    bstcol = bst.reshape(style_dim, 1).astype(jnp.float32)
    wc1mat = jnp.transpose(wc1, (0, 2, 3, 1)).reshape(C_IN, 9 * C_IN).astype(jnp.float32)
    bc1col = bc1.reshape(C_IN, 1).astype(jnp.float32)
    wc2mat = jnp.transpose(wc2, (0, 2, 3, 1)).reshape(1, 9 * C_IN).astype(jnp.float32)
    bc2m = bc2.reshape(1, 1).astype(jnp.float32)

    content_flat, style_col = pl.pallas_call(
        _idn_kernel,
        out_shape=(
            jax.ShapeDtypeStruct((B, OUT_HW, OUT_HW), jnp.float32),
            jax.ShapeDtypeStruct((B, style_dim, 1), jnp.float32),
        ),
        grid_spec=pltpu.PrefetchScalarGridSpec(
            num_scalar_prefetch=0,
            grid=(B,),
            in_specs=[
                pl.BlockSpec((1, C_IN, NPAD), lambda b: (b, 0, 0)),       # xflat
                pl.BlockSpec((1, NPAD), lambda b: (0, 0)),                # ring
                pl.BlockSpec((1, C_IN * 16, 64), lambda b: (b, 0, 0)),    # col1
                pl.BlockSpec((C_IN, C_IN * 16), lambda b: (0, 0)),        # w1mat
                pl.BlockSpec((C_IN, 1), lambda b: (0, 0)),                # b1col
                pl.BlockSpec((C_IN, 64, 64), lambda b: (0, 0, 0)),        # m2
                pl.BlockSpec((1, 64), lambda b: (0, 0)),                  # b2rep
                pl.BlockSpec((style_dim, 2 * C_IN), lambda b: (0, 0)),    # wst
                pl.BlockSpec((style_dim, 1), lambda b: (0, 0)),           # bst
                pl.BlockSpec((C_IN, 9 * C_IN), lambda b: (0, 0)),         # wc1mat
                pl.BlockSpec((C_IN, 1), lambda b: (0, 0)),                # bc1col
                pl.BlockSpec((1, 9 * C_IN), lambda b: (0, 0)),            # wc2mat
                pl.BlockSpec((1, 1), lambda b: (0, 0)),                   # bc2
            ],
            out_specs=(
                pl.BlockSpec((1, OUT_HW, OUT_HW), lambda b: (b, 0, 0)),
                pl.BlockSpec((1, style_dim, 1), lambda b: (b, 0, 0)),
            ),
            scratch_shapes=[
                pltpu.VMEM((C_IN, PAD_SCR), jnp.float32),     # tap-window scratch
                pltpu.VMEM((9 * C_IN, NPAD), jnp.float32),    # im2col scratch
            ],
        ),
        compiler_params=pltpu.CompilerParams(
            dimension_semantics=("parallel",)),
    )(xflat, ring, col1, w1mat, b1col, m2, b2rep, wstm, bstcol,
      wc1mat, bc1col, wc2mat, bc2m)

    content = content_flat.reshape(B, 1, OUT_HW, OUT_HW)
    style = style_col[:, :, 0]
    return content, style


# ----------------------------- pure-JAX reference -----------------------------
def reference_forward(feat, params):
    (w1, b1, w2, b2, wst, bst, wc1, bc1, wc2, bc2) = params
    B, C = feat.shape[0], feat.shape[1]
    x = feat.astype(jnp.float32)
    lrelu = lambda v: jnp.where(v > 0, v, LEAKY * v)

    def conv(v, w, b, stride, pad):
        out = jax.lax.conv_general_dilated(
            v, w, window_strides=(stride, stride),
            padding=((pad, pad), (pad, pad)),
            dimension_numbers=("NCHW", "OIHW", "NCHW"),
            precision=jax.lax.Precision.HIGHEST)
        return out + b.reshape(1, -1, 1, 1)

    h = lrelu(conv(x, w1, b1, 2, 1))
    h = lrelu(conv(h, w2, b2, 2, 1))
    style_mu = jnp.mean(h, axis=(2, 3), keepdims=True)                 # (B,C,1,1)
    x0 = x - style_mu
    sigma = jnp.std(x0.reshape(B, C, -1), axis=-1, ddof=1)             # unbiased
    feat_content = x0 / sigma[:, :, None, None]
    style = jnp.dot(
        jnp.concatenate([style_mu.reshape(B, C), sigma], axis=1), wst.T,
        precision=jax.lax.Precision.HIGHEST) + bst
    c = lrelu(conv(feat_content, wc1, bc1, 1, 1))
    c = lrelu(conv(c, wc2, bc2, 1, 1))
    # AdaptiveAvgPool2d(256) on a 16x16 map is exact 16x nearest replication.
    content = jnp.repeat(jnp.repeat(c, UPS, axis=2), UPS, axis=3)
    return content, style


if __name__ == "__main__":
    B = 2
    style_dim = 32

    key = jax.random.PRNGKey(0)
    ks = jax.random.split(key, 11)
    x = jax.random.normal(ks[0], (B, C_IN, H, W), jnp.float32)

    # Synthetic effective weights (spectral_norm normalization assumed folded in).
    w1 = jax.random.normal(ks[1], (C_IN, C_IN, 4, 4), jnp.float32) * 0.2
    b1 = jax.random.normal(ks[2], (C_IN,), jnp.float32) * 0.1
    w2 = jax.random.normal(ks[3], (C_IN, C_IN, 4, 4), jnp.float32) * 0.2
    b2 = jax.random.normal(ks[4], (C_IN,), jnp.float32) * 0.1
    wst = jax.random.normal(ks[5], (style_dim, 2 * C_IN), jnp.float32) * 0.2
    bst = jax.random.normal(ks[6], (style_dim,), jnp.float32) * 0.1
    wc1 = jax.random.normal(ks[7], (C_IN, C_IN, 3, 3), jnp.float32) * 0.2
    bc1 = jax.random.normal(ks[8], (C_IN,), jnp.float32) * 0.1
    wc2 = jax.random.normal(ks[9], (1, C_IN, 3, 3), jnp.float32) * 0.2
    bc2 = jax.random.normal(ks[10], (1,), jnp.float32) * 0.1
    params = (w1, b1, w2, b2, wst, bst, wc1, bc1, wc2, bc2)

    fwd = jax.jit(idn_layer_forward)
    content, style = jax.block_until_ready(fwd(x, params))
    ref_content, ref_style = jax.block_until_ready(reference_forward(x, params))

    assert content.shape == (B, 1, OUT_HW, OUT_HW)
    assert style.shape == (B, style_dim)
    err_c = float(jnp.max(jnp.abs(content - ref_content)))
    err_s = float(jnp.max(jnp.abs(style - ref_style)))
    assert jnp.allclose(content, ref_content, atol=1e-2, rtol=1e-2), (
        f"content max abs err {err_c}")
    assert jnp.allclose(style, ref_style, atol=1e-2, rtol=1e-2), (
        f"style max abs err {err_s}")
    print("KERNEL_OK")
</pallas_src>

<mosaic_0001>
module attributes {stable_mosaic.version = 11 : i64} {
  func.func @_idn_kernel(%arg0: i32, %arg1: memref<1x4x324xf32, #tpu.memory_space<vmem>>, %arg2: memref<1x324xf32, #tpu.memory_space<vmem>>, %arg3: memref<1x64x64xf32, #tpu.memory_space<vmem>>, %arg4: memref<4x64xf32, #tpu.memory_space<vmem>>, %arg5: memref<4x1xf32, #tpu.memory_space<vmem>>, %arg6: memref<4x64x64xf32, #tpu.memory_space<vmem>>, %arg7: memref<1x64xf32, #tpu.memory_space<vmem>>, %arg8: memref<32x8xf32, #tpu.memory_space<vmem>>, %arg9: memref<32x1xf32, #tpu.memory_space<vmem>>, %arg10: memref<4x36xf32, #tpu.memory_space<vmem>>, %arg11: memref<4x1xf32, #tpu.memory_space<vmem>>, %arg12: memref<1x36xf32, #tpu.memory_space<vmem>>, %arg13: memref<1x1xf32, #tpu.memory_space<vmem>>, %arg14: memref<1x256x256xf32, #tpu.memory_space<vmem>>, %arg15: memref<1x32x1xf32, #tpu.memory_space<vmem>>, %arg16: memref<4x384xf32, #tpu.memory_space<vmem>>, %arg17: memref<36x324xf32, #tpu.memory_space<vmem>>) attributes {dimension_semantics = [#tpu.dimension_semantics<parallel>], iteration_bounds = array<i64: 2>, scalar_prefetch = 0 : i64, scratch_operands = 2 : i64, tpu.core_type = #tpu.core_type<tc>, window_params = [{transform_indices = @transform_0, window_bounds = array<i64: 1, 4, 324>}, {pipeline_mode = #tpu.pipeline_mode<synchronous>, transform_indices = @transform_1, window_bounds = array<i64: 1, 324>}, {transform_indices = @transform_2, window_bounds = array<i64: 1, 64, 64>}, {pipeline_mode = #tpu.pipeline_mode<synchronous>, transform_indices = @transform_3, window_bounds = array<i64: 4, 64>}, {pipeline_mode = #tpu.pipeline_mode<synchronous>, transform_indices = @transform_4, window_bounds = array<i64: 4, 1>}, {pipeline_mode = #tpu.pipeline_mode<synchronous>, transform_indices = @transform_5, window_bounds = array<i64: 4, 64, 64>}, {pipeline_mode = #tpu.pipeline_mode<synchronous>, transform_indices = @transform_6, window_bounds = array<i64: 1, 64>}, {pipeline_mode = #tpu.pipeline_mode<synchronous>, transform_indices = @transform_7, window_bounds = array<i64: 32, 8>}, {pipeline_mode = #tpu.pipeline_mode<synchronous>, transform_indices = @transform_8, window_bounds = array<i64: 32, 1>}, {pipeline_mode = #tpu.pipeline_mode<synchronous>, transform_indices = @transform_9, window_bounds = array<i64: 4, 36>}, {pipeline_mode = #tpu.pipeline_mode<synchronous>, transform_indices = @transform_10, window_bounds = array<i64: 4, 1>}, {pipeline_mode = #tpu.pipeline_mode<synchronous>, transform_indices = @transform_11, window_bounds = array<i64: 1, 36>}, {pipeline_mode = #tpu.pipeline_mode<synchronous>, transform_indices = @transform_12, window_bounds = array<i64: 1, 1>}, {transform_indices = @transform_13, window_bounds = array<i64: 1, 256, 256>}, {transform_indices = @transform_14, window_bounds = array<i64: 1, 32, 1>}]} {
    %c0 = arith.constant 0 : index
    %c0_0 = arith.constant 0 : index
    %c0_1 = arith.constant 0 : index
    %0 = vector.load %arg3[%c0, %c0_0, %c0_1] : memref<1x64x64xf32, #tpu.memory_space<vmem>>, vector<1x64x64xf32>
    %1 = vector.shape_cast %0 : vector<1x64x64xf32> to vector<64x64xf32>
    %c0_2 = arith.constant 0 : index
    %c0_3 = arith.constant 0 : index
    %2 = vector.load %arg4[%c0_2, %c0_3] : memref<4x64xf32, #tpu.memory_space<vmem>>, vector<4x64xf32>
    %cst = arith.constant dense<0.000000e+00> : vector<4x64xf32>
    %3 = tpu.matmul %2, %1, %cst {dimension_numbers = #tpu.dot_dimension_numbers<[1], [0], [0], [1], [0, 0, 1, 1], [], []>} : vector<4x64xf32>, vector<64x64xf32>, vector<4x64xf32> -> vector<4x64xf32>
    %c0_4 = arith.constant 0 : index
    %c0_5 = arith.constant 0 : index
    %4 = vector.load %arg5[%c0_4, %c0_5] : memref<4x1xf32, #tpu.memory_space<vmem>>, vector<4x1xf32>
    %5 = vector.broadcast %4 : vector<4x1xf32> to vector<4x64xf32>
    %6 = arith.addf %3, %5 : vector<4x64xf32>
    %cst_6 = arith.constant 0.000000e+00 : f32
    %7 = vector.broadcast %cst_6 : f32 to vector<4x64xf32>
    %8 = arith.cmpf ogt, %6, %7 : vector<4x64xf32>
    %cst_7 = arith.constant 1.000000e-01 : f32
    %9 = vector.broadcast %cst_7 : f32 to vector<4x64xf32>
    %10 = arith.mulf %9, %6 : vector<4x64xf32>
    %11 = arith.select %8, %6, %10 : vector<4x64xi1>, vector<4x64xf32>
    %c0_8 = arith.constant 0 : index
    %c0_9 = arith.constant 0 : index
    %12 = vector.load %arg7[%c0_8, %c0_9] : memref<1x64xf32, #tpu.memory_space<vmem>>, vector<1x64xf32>
    %13 = vector.extract_strided_slice %11 {offsets = [0, 0], sizes = [1, 64], strides = [1, 1]} : vector<4x64xf32> to vector<1x64xf32>
    %c0_10 = arith.constant 0 : index
    %c0_11 = arith.constant 0 : index
    %c0_12 = arith.constant 0 : index
    %14 = vector.load %arg6[%c0_10, %c0_11, %c0_12] : memref<4x64x64xf32, #tpu.memory_space<vmem>>, vector<1x64x64xf32>
    %15 = vector.shape_cast %14 : vector<1x64x64xf32> to vector<64x64xf32>
    %cst_13 = arith.constant dense<0.000000e+00> : vector<1x64xf32>
    %16 = tpu.matmul %13, %15, %cst_13 {dimension_numbers = #tpu.dot_dimension_numbers<[1], [0], [0], [1], [0, 0, 1, 1], [], []>} : vector<1x64xf32>, vector<64x64xf32>, vector<1x64xf32> -> vector<1x64xf32>
    %17 = arith.addf %12, %16 : vector<1x64xf32>
    %18 = vector.extract_strided_slice %11 {offsets = [1, 0], sizes = [1, 64], strides = [1, 1]} : vector<4x64xf32> to vector<1x64xf32>
    %c1 = arith.constant 1 : index
    %c0_14 = arith.constant 0 : index
    %c0_15 = arith.constant 0 : index
    %19 = vector.load %arg6[%c1, %c0_14, %c0_15] : memref<4x64x64xf32, #tpu.memory_space<vmem>>, vector<1x64x64xf32>
    %20 = vector.shape_cast %19 : vector<1x64x64xf32> to vector<64x64xf32>
    %cst_16 = arith.constant dense<0.000000e+00> : vector<1x64xf32>
    %21 = tpu.matmul %18, %20, %cst_16 {dimension_numbers = #tpu.dot_dimension_numbers<[1], [0], [0], [1], [0, 0, 1, 1], [], []>} : vector<1x64xf32>, vector<64x64xf32>, vector<1x64xf32> -> vector<1x64xf32>
    %22 = arith.addf %17, %21 : vector<1x64xf32>
    %23 = vector.extract_strided_slice %11 {offsets = [2, 0], sizes = [1, 64], strides = [1, 1]} : vector<4x64xf32> to vector<1x64xf32>
    %c2 = arith.constant 2 : index
    %c0_17 = arith.constant 0 : index
    %c0_18 = arith.constant 0 : index
    %24 = vector.load %arg6[%c2, %c0_17, %c0_18] : memref<4x64x64xf32, #tpu.memory_space<vmem>>, vector<1x64x64xf32>
    %25 = vector.shape_cast %24 : vector<1x64x64xf32> to vector<64x64xf32>
    %cst_19 = arith.constant dense<0.000000e+00> : vector<1x64xf32>
    %26 = tpu.matmul %23, %25, %cst_19 {dimension_numbers = #tpu.dot_dimension_numbers<[1], [0], [0], [1], [0, 0, 1, 1], [], []>} : vector<1x64xf32>, vector<64x64xf32>, vector<1x64xf32> -> vector<1x64xf32>
    %27 = arith.addf %22, %26 : vector<1x64xf32>
    %28 = vector.extract_strided_slice %11 {offsets = [3, 0], sizes = [1, 64], strides = [1, 1]} : vector<4x64xf32> to vector<1x64xf32>
    %c3 = arith.constant 3 : index
    %c0_20 = arith.constant 0 : index
    %c0_21 = arith.constant 0 : index
    %29 = vector.load %arg6[%c3, %c0_20, %c0_21] : memref<4x64x64xf32, #tpu.memory_space<vmem>>, vector<1x64x64xf32>
    %30 = vector.shape_cast %29 : vector<1x64x64xf32> to vector<64x64xf32>
    %cst_22 = arith.constant dense<0.000000e+00> : vector<1x64xf32>
    %31 = tpu.matmul %28, %30, %cst_22 {dimension_numbers = #tpu.dot_dimension_numbers<[1], [0], [0], [1], [0, 0, 1, 1], [], []>} : vector<1x64xf32>, vector<64x64xf32>, vector<1x64xf32> -> vector<1x64xf32>
    %32 = arith.addf %27, %31 : vector<1x64xf32>
    %cst_23 = arith.constant 0.000000e+00 : f32
    %33 = vector.broadcast %cst_23 : f32 to vector<1x64xf32>
    %34 = arith.cmpf ogt, %32, %33 : vector<1x64xf32>
    %cst_24 = arith.constant 1.000000e-01 : f32
    %35 = vector.broadcast %cst_24 : f32 to vector<1x64xf32>
    %36 = arith.mulf %35, %32 : vector<1x64xf32>
    %37 = arith.select %34, %32, %36 : vector<1x64xi1>, vector<1x64xf32>
    %38 = tpu.iota {dimensions = array<i32: 0>} : vector<4x1xi32>
    %cst_25 = arith.constant 0.000000e+00 : f32
    %39 = vector.broadcast %cst_25 : f32 to vector<4x1xf32>
    %40 = vector.extract_strided_slice %37 {offsets = [0, 0], sizes = [1, 16], strides = [1, 1]} : vector<1x64xf32> to vector<1x16xf32>
    %cst_26 = arith.constant dense<0.000000e+00> : vector<1xf32>
    %41 = vector.multi_reduction <add>, %40, %cst_26 [1] : vector<1x16xf32> to vector<1xf32>
    %42 = vector.shape_cast %41 : vector<1xf32> to vector<1x1xf32>
    %cst_27 = arith.constant 1.600000e+01 : f32
    %43 = vector.broadcast %cst_27 : f32 to vector<1x1xf32>
    %44 = arith.divf %42, %43 : vector<1x1xf32>
    %c0_i32 = arith.constant 0 : i32
    %45 = vector.broadcast %c0_i32 : i32 to vector<4x1xi32>
    %46 = arith.cmpi eq, %38, %45 : vector<4x1xi32>
    %47 = vector.shape_cast %44 : vector<1x1xf32> to vector<1x1xf32>
    %48 = vector.broadcast %47 : vector<1x1xf32> to vector<4x1xf32>
    %49 = arith.select %46, %48, %39 : vector<4x1xi1>, vector<4x1xf32>
    %50 = vector.extract_strided_slice %37 {offsets = [0, 16], sizes = [1, 16], strides = [1, 1]} : vector<1x64xf32> to vector<1x16xf32>
    %cst_28 = arith.constant dense<0.000000e+00> : vector<1xf32>
    %51 = vector.multi_reduction <add>, %50, %cst_28 [1] : vector<1x16xf32> to vector<1xf32>
    %52 = vector.shape_cast %51 : vector<1xf32> to vector<1x1xf32>
    %cst_29 = arith.constant 1.600000e+01 : f32
    %53 = vector.broadcast %cst_29 : f32 to vector<1x1xf32>
    %54 = arith.divf %52, %53 : vector<1x1xf32>
    %c1_i32 = arith.constant 1 : i32
    %55 = vector.broadcast %c1_i32 : i32 to vector<4x1xi32>
    %56 = arith.cmpi eq, %38, %55 : vector<4x1xi32>
    %57 = vector.shape_cast %54 : vector<1x1xf32> to vector<1x1xf32>
    %58 = vector.broadcast %57 : vector<1x1xf32> to vector<4x1xf32>
    %59 = arith.select %56, %58, %49 : vector<4x1xi1>, vector<4x1xf32>
    %60 = vector.extract_strided_slice %37 {offsets = [0, 32], sizes = [1, 16], strides = [1, 1]} : vector<1x64xf32> to vector<1x16xf32>
    %cst_30 = arith.constant dense<0.000000e+00> : vector<1xf32>
    %61 = vector.multi_reduction <add>, %60, %cst_30 [1] : vector<1x16xf32> to vector<1xf32>
    %62 = vector.shape_cast %61 : vector<1xf32> to vector<1x1xf32>
    %cst_31 = arith.constant 1.600000e+01 : f32
    %63 = vector.broadcast %cst_31 : f32 to vector<1x1xf32>
    %64 = arith.divf %62, %63 : vector<1x1xf32>
    %c2_i32 = arith.constant 2 : i32
    %65 = vector.broadcast %c2_i32 : i32 to vector<4x1xi32>
    %66 = arith.cmpi eq, %38, %65 : vector<4x1xi32>
    %67 = vector.shape_cast %64 : vector<1x1xf32> to vector<1x1xf32>
    %68 = vector.broadcast %67 : vector<1x1xf32> to vector<4x1xf32>
    %69 = arith.select %66, %68, %59 : vector<4x1xi1>, vector<4x1xf32>
    %70 = vector.extract_strided_slice %37 {offsets = [0, 48], sizes = [1, 16], strides = [1, 1]} : vector<1x64xf32> to vector<1x16xf32>
    %cst_32 = arith.constant dense<0.000000e+00> : vector<1xf32>
    %71 = vector.multi_reduction <add>, %70, %cst_32 [1] : vector<1x16xf32> to vector<1xf32>
    %72 = vector.shape_cast %71 : vector<1xf32> to vector<1x1xf32>
    %cst_33 = arith.constant 1.600000e+01 : f32
    %73 = vector.broadcast %cst_33 : f32 to vector<1x1xf32>
    %74 = arith.divf %72, %73 : vector<1x1xf32>
    %c3_i32 = arith.constant 3 : i32
    %75 = vector.broadcast %c3_i32 : i32 to vector<4x1xi32>
    %76 = arith.cmpi eq, %38, %75 : vector<4x1xi32>
    %77 = vector.shape_cast %74 : vector<1x1xf32> to vector<1x1xf32>
    %78 = vector.broadcast %77 : vector<1x1xf32> to vector<4x1xf32>
    %79 = arith.select %76, %78, %69 : vector<4x1xi1>, vector<4x1xf32>
    %c0_34 = arith.constant 0 : index
    %c0_35 = arith.constant 0 : index
    %c0_36 = arith.constant 0 : index
    %80 = vector.load %arg1[%c0_34, %c0_35, %c0_36] : memref<1x4x324xf32, #tpu.memory_space<vmem>>, vector<1x4x324xf32>
    %81 = vector.shape_cast %80 : vector<1x4x324xf32> to vector<4x324xf32>
    %c0_37 = arith.constant 0 : index
    %c0_38 = arith.constant 0 : index
    %82 = vector.load %arg2[%c0_37, %c0_38] : memref<1x324xf32, #tpu.memory_space<vmem>>, vector<1x324xf32>
    %cst_39 = arith.constant 5.000000e-01 : f32
    %83 = vector.broadcast %cst_39 : f32 to vector<1x324xf32>
    %84 = arith.cmpf ogt, %82, %83 : vector<1x324xf32>
    %cst_40 = arith.constant dense<0.000000e+00> : vector<4xf32>
    %85 = vector.multi_reduction <add>, %81, %cst_40 [1] : vector<4x324xf32> to vector<4xf32>
    %86 = vector.shape_cast %85 : vector<4xf32> to vector<4x1xf32>
    %cst_41 = arith.constant 3.906250e-03 : f32
    %87 = vector.broadcast %cst_41 : f32 to vector<4x1xf32>
    %88 = arith.mulf %86, %87 : vector<4x1xf32>
    %89 = vector.broadcast %88 : vector<4x1xf32> to vector<4x324xf32>
    %90 = arith.subf %81, %89 : vector<4x324xf32>
    %cst_42 = arith.constant 0.000000e+00 : f32
    %91 = vector.shape_cast %84 : vector<1x324xi1> to vector<1x324xi1>
    %92 = vector.broadcast %91 : vector<1x324xi1> to vector<4x324xi1>
    %93 = vector.broadcast %cst_42 : f32 to vector<4x324xf32>
    %94 = arith.select %92, %90, %93 : vector<4x324xi1>, vector<4x324xf32>
    %95 = arith.mulf %94, %94 : vector<4x324xf32>
    %cst_43 = arith.constant dense<0.000000e+00> : vector<4xf32>
    %96 = vector.multi_reduction <add>, %95, %cst_43 [1] : vector<4x324xf32> to vector<4xf32>
    %97 = vector.shape_cast %96 : vector<4xf32> to vector<4x1xf32>
    %cst_44 = arith.constant 0.00392156886 : f32
    %98 = vector.broadcast %cst_44 : f32 to vector<4x1xf32>
    %99 = arith.mulf %97, %98 : vector<4x1xf32>
    %100 = math.sqrt %99 : vector<4x1xf32>
    %c0_45 = arith.constant 0 : index
    %c0_46 = arith.constant 0 : index
    %101 = vector.load %arg8[%c0_45, %c0_46] : memref<32x8xf32, #tpu.memory_space<vmem>>, vector<32x4xf32>
    %cst_47 = arith.constant dense<0.000000e+00> : vector<32x1xf32>
    %102 = tpu.matmul %101, %79, %cst_47 {dimension_numbers = #tpu.dot_dimension_numbers<[1], [0], [0], [1], [0, 0, 1, 1], [], []>} : vector<32x4xf32>, vector<4x1xf32>, vector<32x1xf32> -> vector<32x1xf32>
    %c0_48 = arith.constant 0 : index
    %c4 = arith.constant 4 : index
    %103 = vector.load %arg8[%c0_48, %c4] : memref<32x8xf32, #tpu.memory_space<vmem>>, vector<32x4xf32>
    %cst_49 = arith.constant dense<0.000000e+00> : vector<32x1xf32>
    %104 = tpu.matmul %103, %100, %cst_49 {dimension_numbers = #tpu.dot_dimension_numbers<[1], [0], [0], [1], [0, 0, 1, 1], [], []>} : vector<32x4xf32>, vector<4x1xf32>, vector<32x1xf32> -> vector<32x1xf32>
    %105 = arith.addf %102, %104 : vector<32x1xf32>
    %c0_50 = arith.constant 0 : index
    %c0_51 = arith.constant 0 : index
    %106 = vector.load %arg9[%c0_50, %c0_51] : memref<32x1xf32, #tpu.memory_space<vmem>>, vector<32x1xf32>
    %107 = arith.addf %105, %106 : vector<32x1xf32>
    %c0_52 = arith.constant 0 : index
    %c0_53 = arith.constant 0 : index
    %c0_54 = arith.constant 0 : index
    %108 = vector.load %arg15[%c0_52, %c0_53, %c0_54] : memref<1x32x1xf32, #tpu.memory_space<vmem>>, vector<1x32x1xf32>
    %109 = vector.shape_cast %108 : vector<1x32x1xf32> to vector<32x1xf32>
    %110 = vector.shape_cast %107 : vector<32x1xf32> to vector<1x32x1xf32>
    tpu.vector_store %arg15[%c0_52, %c0_53, %c0_54], %110 {strides = array<i32>} : memref<1x32x1xf32, #tpu.memory_space<vmem>>, vector<1x32x1xf32>,
    %111 = vector.broadcast %79 : vector<4x1xf32> to vector<4x324xf32>
    %112 = arith.subf %81, %111 : vector<4x324xf32>
    %113 = vector.broadcast %100 : vector<4x1xf32> to vector<4x324xf32>
    %114 = arith.divf %112, %113 : vector<4x324xf32>
    %cst_55 = arith.constant 0.000000e+00 : f32
    %115 = vector.shape_cast %84 : vector<1x324xi1> to vector<1x324xi1>
    %116 = vector.broadcast %115 : vector<1x324xi1> to vector<4x324xi1>
    %117 = vector.broadcast %cst_55 : f32 to vector<4x324xf32>
    %118 = arith.select %116, %114, %117 : vector<4x324xi1>, vector<4x324xf32>
    %c0_56 = arith.constant 0 : index
    %c0_57 = arith.constant 0 : index
    %119 = vector.load %arg10[%c0_56, %c0_57] : memref<4x36xf32, #tpu.memory_space<vmem>>, vector<4x36xf32>
    %c0_58 = arith.constant 0 : index
    %c0_59 = arith.constant 0 : index
    %120 = vector.load %arg11[%c0_58, %c0_59] : memref<4x1xf32, #tpu.memory_space<vmem>>, vector<4x1xf32>
    %c0_60 = arith.constant 0 : index
    %c19 = arith.constant 19 : index
    %121 = vector.load %arg16[%c0_60, %c19] : memref<4x384xf32, #tpu.memory_space<vmem>>, vector<4x324xf32>
    tpu.vector_store %arg16[%c0_60, %c19], %118 {strides = array<i32>} : memref<4x384xf32, #tpu.memory_space<vmem>>, vector<4x324xf32>,
    %c0_61 = arith.constant 0 : index
    %c0_62 = arith.constant 0 : index
    %122 = vector.load %arg16[%c0_61, %c0_62] : memref<4x384xf32, #tpu.memory_space<vmem>>, vector<4x324xf32>
    %c0_63 = arith.constant 0 : index
    %c0_64 = arith.constant 0 : index
    %123 = vector.load %arg17[%c0_63, %c0_64] : memref<36x324xf32, #tpu.memory_space<vmem>>, vector<4x324xf32>
    tpu.vector_store %arg17[%c0_63, %c0_64], %122 {strides = array<i32>} : memref<36x324xf32, #tpu.memory_space<vmem>>, vector<4x324xf32>,
    %c0_65 = arith.constant 0 : index
    %c1_66 = arith.constant 1 : index
    %124 = vector.load %arg16[%c0_65, %c1_66] : memref<4x384xf32, #tpu.memory_space<vmem>>, vector<4x324xf32>
    %c4_67 = arith.constant 4 : index
    %c0_68 = arith.constant 0 : index
    %125 = vector.load %arg17[%c4_67, %c0_68] : memref<36x324xf32, #tpu.memory_space<vmem>>, vector<4x324xf32>
    tpu.vector_store %arg17[%c4_67, %c0_68], %124 {strides = array<i32>} : memref<36x324xf32, #tpu.memory_space<vmem>>, vector<4x324xf32>,
    %c0_69 = arith.constant 0 : index
    %c2_70 = arith.constant 2 : index
    %126 = vector.load %arg16[%c0_69, %c2_70] : memref<4x384xf32, #tpu.memory_space<vmem>>, vector<4x324xf32>
    %c8 = arith.constant 8 : index
    %c0_71 = arith.constant 0 : index
    %127 = vector.load %arg17[%c8, %c0_71] : memref<36x324xf32, #tpu.memory_space<vmem>>, vector<4x324xf32>
    tpu.vector_store %arg17[%c8, %c0_71], %126 {strides = array<i32>} : memref<36x324xf32, #tpu.memory_space<vmem>>, vector<4x324xf32>,
    %c0_72 = arith.constant 0 : index
    %c18 = arith.constant 18 : index
    %128 = vector.load %arg16[%c0_72, %c18] : memref<4x384xf32, #tpu.memory_space<vmem>>, vector<4x324xf32>
    %c12 = arith.constant 12 : index
    %c0_73 = arith.constant 0 : index
    %129 = vector.load %arg17[%c12, %c0_73] : memref<36x324xf32, #tpu.memory_space<vmem>>, vector<4x324xf32>
    tpu.vector_store %arg17[%c12, %c0_73], %128 {strides = array<i32>} : memref<36x324xf32, #tpu.memory_space<vmem>>, vector<4x324xf32>,
    %c0_74 = arith.constant 0 : index
    %c19_75 = arith.constant 19 : index
    %130 = vector.load %arg16[%c0_74, %c19_75] : memref<4x384xf32, #tpu.memory_space<vmem>>, vector<4x324xf32>
    %c16 = arith.constant 16 : index
    %c0_76 = arith.constant 0 : index
    %131 = vector.load %arg17[%c16, %c0_76] : memref<36x324xf32, #tpu.memory_space<vmem>>, vector<4x324xf32>
    tpu.vector_store %arg17[%c16, %c0_76], %130 {strides = array<i32>} : memref<36x324xf32, #tpu.memory_space<vmem>>, vector<4x324xf32>,
    %c0_77 = arith.constant 0 : index
    %c20 = arith.constant 20 : index
    %132 = vector.load %arg16[%c0_77, %c20] : memref<4x384xf32, #tpu.memory_space<vmem>>, vector<4x324xf32>
    %c20_78 = arith.constant 20 : index
    %c0_79 = arith.constant 0 : index
    %133 = vector.load %arg17[%c20_78, %c0_79] : memref<36x324xf32, #tpu.memory_space<vmem>>, vector<4x324xf32>
    tpu.vector_store %arg17[%c20_78, %c0_79], %132 {strides = array<i32>} : memref<36x324xf32, #tpu.memory_space<vmem>>, vector<4x324xf32>,
    %c0_80 = arith.constant 0 : index
    %c36 = arith.constant 36 : index
    %134 = vector.load %arg16[%c0_80, %c36] : memref<4x384xf32, #tpu.memory_space<vmem>>, vector<4x324xf32>
    %c24 = arith.constant 24 : index
    %c0_81 = arith.constant 0 : index
    %135 = vector.load %arg17[%c24, %c0_81] : memref<36x324xf32, #tpu.memory_space<vmem>>, vector<4x324xf32>
    tpu.vector_store %arg17[%c24, %c0_81], %134 {strides = array<i32>} : memref<36x324xf32, #tpu.memory_space<vmem>>, vector<4x324xf32>,
    %c0_82 = arith.constant 0 : index
    %c37 = arith.constant 37 : index
    %136 = vector.load %arg16[%c0_82, %c37] : memref<4x384xf32, #tpu.memory_space<vmem>>, vector<4x324xf32>
    %c28 = arith.constant 28 : index
    %c0_83 = arith.constant 0 : index
    %137 = vector.load %arg17[%c28, %c0_83] : memref<36x324xf32, #tpu.memory_space<vmem>>, vector<4x324xf32>
    tpu.vector_store %arg17[%c28, %c0_83], %136 {strides = array<i32>} : memref<36x324xf32, #tpu.memory_space<vmem>>, vector<4x324xf32>,
    %c0_84 = arith.constant 0 : index
    %c38 = arith.constant 38 : index
    %138 = vector.load %arg16[%c0_84, %c38] : memref<4x384xf32, #tpu.memory_space<vmem>>, vector<4x324xf32>
    %c32 = arith.constant 32 : index
    %c0_85 = arith.constant 0 : index
    %139 = vector.load %arg17[%c32, %c0_85] : memref<36x324xf32, #tpu.memory_space<vmem>>, vector<4x324xf32>
    tpu.vector_store %arg17[%c32, %c0_85], %138 {strides = array<i32>} : memref<36x324xf32, #tpu.memory_space<vmem>>, vector<4x324xf32>,
    %c0_86 = arith.constant 0 : index
    %c0_87 = arith.constant 0 : index
    %140 = vector.load %arg17[%c0_86, %c0_87] : memref<36x324xf32, #tpu.memory_space<vmem>>, vector<36x324xf32>
    %cst_88 = arith.constant dense<0.000000e+00> : vector<4x324xf32>
    %141 = tpu.matmul %119, %140, %cst_88 {dimension_numbers = #tpu.dot_dimension_numbers<[1], [0], [0], [1], [0, 0, 1, 1], [], []>} : vector<4x36xf32>, vector<36x324xf32>, vector<4x324xf32> -> vector<4x324xf32>
    %142 = vector.broadcast %120 : vector<4x1xf32> to vector<4x324xf32>
    %143 = arith.addf %141, %142 : vector<4x324xf32>
    %cst_89 = arith.constant 0.000000e+00 : f32
    %144 = vector.broadcast %cst_89 : f32 to vector<4x324xf32>
    %145 = arith.cmpf ogt, %143, %144 : vector<4x324xf32>
    %cst_90 = arith.constant 1.000000e-01 : f32
    %146 = vector.broadcast %cst_90 : f32 to vector<4x324xf32>
    %147 = arith.mulf %146, %143 : vector<4x324xf32>
    %148 = arith.select %145, %143, %147 : vector<4x324xi1>, vector<4x324xf32>
    %cst_91 = arith.constant 0.000000e+00 : f32
    %149 = vector.shape_cast %84 : vector<1x324xi1> to vector<1x324xi1>
    %150 = vector.broadcast %149 : vector<1x324xi1> to vector<4x324xi1>
    %151 = vector.broadcast %cst_91 : f32 to vector<4x324xf32>
    %152 = arith.select %150, %148, %151 : vector<4x324xi1>, vector<4x324xf32>
    %c0_92 = arith.constant 0 : index
    %c0_93 = arith.constant 0 : index
    %153 = vector.load %arg12[%c0_92, %c0_93] : memref<1x36xf32, #tpu.memory_space<vmem>>, vector<1x36xf32>
    %c0_94 = arith.constant 0 : index
    %c0_95 = arith.constant 0 : index
    %154 = vector.load %arg13[%c0_94, %c0_95] : memref<1x1xf32, #tpu.memory_space<vmem>>, vector<1x1xf32>
    %c0_96 = arith.constant 0 : index
    %c19_97 = arith.constant 19 : index
    %155 = vector.load %arg16[%c0_96, %c19_97] : memref<4x384xf32, #tpu.memory_space<vmem>>, vector<4x324xf32>
    tpu.vector_store %arg16[%c0_96, %c19_97], %152 {strides = array<i32>} : memref<4x384xf32, #tpu.memory_space<vmem>>, vector<4x324xf32>,
    %c0_98 = arith.constant 0 : index
    %c0_99 = arith.constant 0 : index
    %156 = vector.load %arg16[%c0_98, %c0_99] : memref<4x384xf32, #tpu.memory_space<vmem>>, vector<4x324xf32>
    %c0_100 = arith.constant 0 : index
    %c0_101 = arith.constant 0 : index
    %157 = vector.load %arg17[%c0_100, %c0_101] : memref<36x324xf32, #tpu.memory_space<vmem>>, vector<4x324xf32>
    tpu.vector_store %arg17[%c0_100, %c0_101], %156 {strides = array<i32>} : memref<36x324xf32, #tpu.memory_space<vmem>>, vector<4x324xf32>,
    %c0_102 = arith.constant 0 : index
    %c1_103 = arith.constant 1 : index
    %158 = vector.load %arg16[%c0_102, %c1_103] : memref<4x384xf32, #tpu.memory_space<vmem>>, vector<4x324xf32>
    %c4_104 = arith.constant 4 : index
    %c0_105 = arith.constant 0 : index
    %159 = vector.load %arg17[%c4_104, %c0_105] : memref<36x324xf32, #tpu.memory_space<vmem>>, vector<4x324xf32>
    tpu.vector_store %arg17[%c4_104, %c0_105], %158 {strides = array<i32>} : memref<36x324xf32, #tpu.memory_space<vmem>>, vector<4x324xf32>,
    %c0_106 = arith.constant 0 : index
    %c2_107 = arith.constant 2 : index
    %160 = vector.load %arg16[%c0_106, %c2_107] : memref<4x384xf32, #tpu.memory_space<vmem>>, vector<4x324xf32>
    %c8_108 = arith.constant 8 : index
    %c0_109 = arith.constant 0 : index
    %161 = vector.load %arg17[%c8_108, %c0_109] : memref<36x324xf32, #tpu.memory_space<vmem>>, vector<4x324xf32>
    tpu.vector_store %arg17[%c8_108, %c0_109], %160 {strides = array<i32>} : memref<36x324xf32, #tpu.memory_space<vmem>>, vector<4x324xf32>,
    %c0_110 = arith.constant 0 : index
    %c18_111 = arith.constant 18 : index
    %162 = vector.load %arg16[%c0_110, %c18_111] : memref<4x384xf32, #tpu.memory_space<vmem>>, vector<4x324xf32>
    %c12_112 = arith.constant 12 : index
    %c0_113 = arith.constant 0 : index
    %163 = vector.load %arg17[%c12_112, %c0_113] : memref<36x324xf32, #tpu.memory_space<vmem>>, vector<4x324xf32>
    tpu.vector_store %arg17[%c12_112, %c0_113], %162 {strides = array<i32>} : memref<36x324xf32, #tpu.memory_space<vmem>>, vector<4x324xf32>,
    %c0_114 = arith.constant 0 : index
    %c19_115 = arith.constant 19 : index
    %164 = vector.load %arg16[%c0_114, %c19_115] : memref<4x384xf32, #tpu.memory_space<vmem>>, vector<4x324xf32>
    %c16_116 = arith.constant 16 : index
    %c0_117 = arith.constant 0 : index
    %165 = vector.load %arg17[%c16_116, %c0_117] : memref<36x324xf32, #tpu.memory_space<vmem>>, vector<4x324xf32>
    tpu.vector_store %arg17[%c16_116, %c0_117], %164 {strides = array<i32>} : memref<36x324xf32, #tpu.memory_space<vmem>>, vector<4x324xf32>,
    %c0_118 = arith.constant 0 : index
    %c20_119 = arith.constant 20 : index
    %166 = vector.load %arg16[%c0_118, %c20_119] : memref<4x384xf32, #tpu.memory_space<vmem>>, vector<4x324xf32>
    %c20_120 = arith.constant 20 : index
    %c0_121 = arith.constant 0 : index
    %167 = vector.load %arg17[%c20_120, %c0_121] : memref<36x324xf32, #tpu.memory_space<vmem>>, vector<4x324xf32>
    tpu.vector_store %arg17[%c20_120, %c0_121], %166 {strides = array<i32>} : memref<36x324xf32, #tpu.memory_space<vmem>>, vector<4x324xf32>,
    %c0_122 = arith.constant 0 : index
    %c36_123 = arith.constant 36 : index
    %168 = vector.load %arg16[%c0_122, %c36_123] : memref<4x384xf32, #tpu.memory_space<vmem>>, vector<4x324xf32>
    %c24_124 = arith.constant 24 : index
    %c0_125 = arith.constant 0 : index
    %169 = vector.load %arg17[%c24_124, %c0_125] : memref<36x324xf32, #tpu.memory_space<vmem>>, vector<4x324xf32>
    tpu.vector_store %arg17[%c24_124, %c0_125], %168 {strides = array<i32>} : memref<36x324xf32, #tpu.memory_space<vmem>>, vector<4x324xf32>,
    %c0_126 = arith.constant 0 : index
    %c37_127 = arith.constant 37 : index
    %170 = vector.load %arg16[%c0_126, %c37_127] : memref<4x384xf32, #tpu.memory_space<vmem>>, vector<4x324xf32>
    %c28_128 = arith.constant 28 : index
    %c0_129 = arith.constant 0 : index
    %171 = vector.load %arg17[%c28_128, %c0_129] : memref<36x324xf32, #tpu.memory_space<vmem>>, vector<4x324xf32>
    tpu.vector_store %arg17[%c28_128, %c0_129], %170 {strides = array<i32>} : memref<36x324xf32, #tpu.memory_space<vmem>>, vector<4x324xf32>,
    %c0_130 = arith.constant 0 : index
    %c38_131 = arith.constant 38 : index
    %172 = vector.load %arg16[%c0_130, %c38_131] : memref<4x384xf32, #tpu.memory_space<vmem>>, vector<4x324xf32>
    %c32_132 = arith.constant 32 : index
    %c0_133 = arith.constant 0 : index
    %173 = vector.load %arg17[%c32_132, %c0_133] : memref<36x324xf32, #tpu.memory_space<vmem>>, vector<4x324xf32>
    tpu.vector_store %arg17[%c32_132, %c0_133], %172 {strides = array<i32>} : memref<36x324xf32, #tpu.memory_space<vmem>>, vector<4x324xf32>,
    %c0_134 = arith.constant 0 : index
    %c0_135 = arith.constant 0 : index
    %174 = vector.load %arg17[%c0_134, %c0_135] : memref<36x324xf32, #tpu.memory_space<vmem>>, vector<36x324xf32>
    %cst_136 = arith.constant dense<0.000000e+00> : vector<1x324xf32>
    %175 = tpu.matmul %153, %174, %cst_136 {dimension_numbers = #tpu.dot_dimension_numbers<[1], [0], [0], [1], [0, 0, 1, 1], [], []>} : vector<1x36xf32>, vector<36x324xf32>, vector<1x324xf32> -> vector<1x324xf32>
    %176 = vector.broadcast %154 : vector<1x1xf32> to vector<1x324xf32>
    %177 = arith.addf %175, %176 : vector<1x324xf32>
    %cst_137 = arith.constant 0.000000e+00 : f32
    %178 = vector.broadcast %cst_137 : f32 to vector<1x324xf32>
    %179 = arith.cmpf ogt, %177, %178 : vector<1x324xf32>
    %cst_138 = arith.constant 1.000000e-01 : f32
    %180 = vector.broadcast %cst_138 : f32 to vector<1x324xf32>
    %181 = arith.mulf %180, %177 : vector<1x324xf32>
    %182 = arith.select %179, %177, %181 : vector<1x324xi1>, vector<1x324xf32>
    %183 = tpu.iota {dimensions = array<i32: 0>} : vector<16x16xi32>
    %cst_139 = arith.constant 0.000000e+00 : f32
    %184 = vector.broadcast %cst_139 : f32 to vector<16x16xf32>
    %c0_i32_140 = arith.constant 0 : i32
    %185 = vector.broadcast %c0_i32_140 : i32 to vector<16x16xi32>
    %186 = arith.cmpi eq, %183, %185 : vector<16x16xi32>
    %187 = vector.extract_strided_slice %182 {offsets = [0, 19], sizes = [1, 16], strides = [1, 1]} : vector<1x324xf32> to vector<1x16xf32>
    %188 = vector.shape_cast %187 : vector<1x16xf32> to vector<1x16xf32>
    %189 = vector.broadcast %188 : vector<1x16xf32> to vector<16x16xf32>
    %190 = arith.select %186, %189, %184 : vector<16x16xi1>, vector<16x16xf32>
    %c1_i32_141 = arith.constant 1 : i32
    %191 = vector.broadcast %c1_i32_141 : i32 to vector<16x16xi32>
    %192 = arith.cmpi eq, %183, %191 : vector<16x16xi32>
    %193 = vector.extract_strided_slice %182 {offsets = [0, 37], sizes = [1, 16], strides = [1, 1]} : vector<1x324xf32> to vector<1x16xf32>
    %194 = vector.shape_cast %193 : vector<1x16xf32> to vector<1x16xf32>
    %195 = vector.broadcast %194 : vector<1x16xf32> to vector<16x16xf32>
    %196 = arith.select %192, %195, %190 : vector<16x16xi1>, vector<16x16xf32>
    %c2_i32_142 = arith.constant 2 : i32
    %197 = vector.broadcast %c2_i32_142 : i32 to vector<16x16xi32>
    %198 = arith.cmpi eq, %183, %197 : vector<16x16xi32>
    %199 = vector.extract_strided_slice %182 {offsets = [0, 55], sizes = [1, 16], strides = [1, 1]} : vector<1x324xf32> to vector<1x16xf32>
    %200 = vector.shape_cast %199 : vector<1x16xf32> to vector<1x16xf32>
    %201 = vector.broadcast %200 : vector<1x16xf32> to vector<16x16xf32>
    %202 = arith.select %198, %201, %196 : vector<16x16xi1>, vector<16x16xf32>
    %c3_i32_143 = arith.constant 3 : i32
    %203 = vector.broadcast %c3_i32_143 : i32 to vector<16x16xi32>
    %204 = arith.cmpi eq, %183, %203 : vector<16x16xi32>
    %205 = vector.extract_strided_slice %182 {offsets = [0, 73], sizes = [1, 16], strides = [1, 1]} : vector<1x324xf32> to vector<1x16xf32>
    %206 = vector.shape_cast %205 : vector<1x16xf32> to vector<1x16xf32>
    %207 = vector.broadcast %206 : vector<1x16xf32> to vector<16x16xf32>
    %208 = arith.select %204, %207, %202 : vector<16x16xi1>, vector<16x16xf32>
    %c4_i32 = arith.constant 4 : i32
    %209 = vector.broadcast %c4_i32 : i32 to vector<16x16xi32>
    %210 = arith.cmpi eq, %183, %209 : vector<16x16xi32>
    %211 = vector.extract_strided_slice %182 {offsets = [0, 91], sizes = [1, 16], strides = [1, 1]} : vector<1x324xf32> to vector<1x16xf32>
    %212 = vector.shape_cast %211 : vector<1x16xf32> to vector<1x16xf32>
    %213 = vector.broadcast %212 : vector<1x16xf32> to vector<16x16xf32>
    %214 = arith.select %210, %213, %208 : vector<16x16xi1>, vector<16x16xf32>
    %c5_i32 = arith.constant 5 : i32
    %215 = vector.broadcast %c5_i32 : i32 to vector<16x16xi32>
    %216 = arith.cmpi eq, %183, %215 : vector<16x16xi32>
    %217 = vector.extract_strided_slice %182 {offsets = [0, 109], sizes = [1, 16], strides = [1, 1]} : vector<1x324xf32> to vector<1x16xf32>
    %218 = vector.shape_cast %217 : vector<1x16xf32> to vector<1x16xf32>
    %219 = vector.broadcast %218 : vector<1x16xf32> to vector<16x16xf32>
    %220 = arith.select %216, %219, %214 : vector<16x16xi1>, vector<16x16xf32>
    %c6_i32 = arith.constant 6 : i32
    %221 = vector.broadcast %c6_i32 : i32 to vector<16x16xi32>
    %222 = arith.cmpi eq, %183, %221 : vector<16x16xi32>
    %223 = vector.extract_strided_slice %182 {offsets = [0, 127], sizes = [1, 16], strides = [1, 1]} : vector<1x324xf32> to vector<1x16xf32>
    %224 = vector.shape_cast %223 : vector<1x16xf32> to vector<1x16xf32>
    %225 = vector.broadcast %224 : vector<1x16xf32> to vector<16x16xf32>
    %226 = arith.select %222, %225, %220 : vector<16x16xi1>, vector<16x16xf32>
    %c7_i32 = arith.constant 7 : i32
    %227 = vector.broadcast %c7_i32 : i32 to vector<16x16xi32>
    %228 = arith.cmpi eq, %183, %227 : vector<16x16xi32>
    %229 = vector.extract_strided_slice %182 {offsets = [0, 145], sizes = [1, 16], strides = [1, 1]} : vector<1x324xf32> to vector<1x16xf32>
    %230 = vector.shape_cast %229 : vector<1x16xf32> to vector<1x16xf32>
    %231 = vector.broadcast %230 : vector<1x16xf32> to vector<16x16xf32>
    %232 = arith.select %228, %231, %226 : vector<16x16xi1>, vector<16x16xf32>
    %c8_i32 = arith.constant 8 : i32
    %233 = vector.broadcast %c8_i32 : i32 to vector<16x16xi32>
    %234 = arith.cmpi eq, %183, %233 : vector<16x16xi32>
    %235 = vector.extract_strided_slice %182 {offsets = [0, 163], sizes = [1, 16], strides = [1, 1]} : vector<1x324xf32> to vector<1x16xf32>
    %236 = vector.shape_cast %235 : vector<1x16xf32> to vector<1x16xf32>
    %237 = vector.broadcast %236 : vector<1x16xf32> to vector<16x16xf32>
    %238 = arith.select %234, %237, %232 : vector<16x16xi1>, vector<16x16xf32>
    %c9_i32 = arith.constant 9 : i32
    %239 = vector.broadcast %c9_i32 : i32 to vector<16x16xi32>
    %240 = arith.cmpi eq, %183, %239 : vector<16x16xi32>
    %241 = vector.extract_strided_slice %182 {offsets = [0, 181], sizes = [1, 16], strides = [1, 1]} : vector<1x324xf32> to vector<1x16xf32>
    %242 = vector.shape_cast %241 : vector<1x16xf32> to vector<1x16xf32>
    %243 = vector.broadcast %242 : vector<1x16xf32> to vector<16x16xf32>
    %244 = arith.select %240, %243, %238 : vector<16x16xi1>, vector<16x16xf32>
    %c10_i32 = arith.constant 10 : i32
    %245 = vector.broadcast %c10_i32 : i32 to vector<16x16xi32>
    %246 = arith.cmpi eq, %183, %245 : vector<16x16xi32>
    %247 = vector.extract_strided_slice %182 {offsets = [0, 199], sizes = [1, 16], strides = [1, 1]} : vector<1x324xf32> to vector<1x16xf32>
    %248 = vector.shape_cast %247 : vector<1x16xf32> to vector<1x16xf32>
    %249 = vector.broadcast %248 : vector<1x16xf32> to vector<16x16xf32>
    %250 = arith.select %246, %249, %244 : vector<16x16xi1>, vector<16x16xf32>
    %c11_i32 = arith.constant 11 : i32
    %251 = vector.broadcast %c11_i32 : i32 to vector<16x16xi32>
    %252 = arith.cmpi eq, %183, %251 : vector<16x16xi32>
    %253 = vector.extract_strided_slice %182 {offsets = [0, 217], sizes = [1, 16], strides = [1, 1]} : vector<1x324xf32> to vector<1x16xf32>
    %254 = vector.shape_cast %253 : vector<1x16xf32> to vector<1x16xf32>
    %255 = vector.broadcast %254 : vector<1x16xf32> to vector<16x16xf32>
    %256 = arith.select %252, %255, %250 : vector<16x16xi1>, vector<16x16xf32>
    %c12_i32 = arith.constant 12 : i32
    %257 = vector.broadcast %c12_i32 : i32 to vector<16x16xi32>
    %258 = arith.cmpi eq, %183, %257 : vector<16x16xi32>
    %259 = vector.extract_strided_slice %182 {offsets = [0, 235], sizes = [1, 16], strides = [1, 1]} : vector<1x324xf32> to vector<1x16xf32>
    %260 = vector.shape_cast %259 : vector<1x16xf32> to vector<1x16xf32>
    %261 = vector.broadcast %260 : vector<1x16xf32> to vector<16x16xf32>
    %262 = arith.select %258, %261, %256 : vector<16x16xi1>, vector<16x16xf32>
    %c13_i32 = arith.constant 13 : i32
    %263 = vector.broadcast %c13_i32 : i32 to vector<16x16xi32>
    %264 = arith.cmpi eq, %183, %263 : vector<16x16xi32>
    %265 = vector.extract_strided_slice %182 {offsets = [0, 253], sizes = [1, 16], strides = [1, 1]} : vector<1x324xf32> to vector<1x16xf32>
    %266 = vector.shape_cast %265 : vector<1x16xf32> to vector<1x16xf32>
    %267 = vector.broadcast %266 : vector<1x16xf32> to vector<16x16xf32>
    %268 = arith.select %264, %267, %262 : vector<16x16xi1>, vector<16x16xf32>
    %c14_i32 = arith.constant 14 : i32
    %269 = vector.broadcast %c14_i32 : i32 to vector<16x16xi32>
    %270 = arith.cmpi eq, %183, %269 : vector<16x16xi32>
    %271 = vector.extract_strided_slice %182 {offsets = [0, 271], sizes = [1, 16], strides = [1, 1]} : vector<1x324xf32> to vector<1x16xf32>
    %272 = vector.shape_cast %271 : vector<1x16xf32> to vector<1x16xf32>
    %273 = vector.broadcast %272 : vector<1x16xf32> to vector<16x16xf32>
    %274 = arith.select %270, %273, %268 : vector<16x16xi1>, vector<16x16xf32>
    %c15_i32 = arith.constant 15 : i32
    %275 = vector.broadcast %c15_i32 : i32 to vector<16x16xi32>
    %276 = arith.cmpi eq, %183, %275 : vector<16x16xi32>
    %277 = vector.extract_strided_slice %182 {offsets = [0, 289], sizes = [1, 16], strides = [1, 1]} : vector<1x324xf32> to vector<1x16xf32>
    %278 = vector.shape_cast %277 : vector<1x16xf32> to vector<1x16xf32>
    %279 = vector.broadcast %278 : vector<1x16xf32> to vector<16x16xf32>
    %280 = arith.select %276, %279, %274 : vector<16x16xi1>, vector<16x16xf32>
    %281 = tpu.iota {dimensions = array<i32: 0>} : vector<16x256xi32>
    %282 = tpu.iota {dimensions = array<i32: 1>} : vector<16x256xi32>
    %c16_i32 = arith.constant 16 : i32
    %283 = vector.broadcast %c16_i32 : i32 to vector<16x256xi32>
    %284 = arith.muli %283, %281 : vector<16x256xi32>
    %285 = arith.cmpi sge, %282, %284 : vector<16x256xi32>
    %c16_i32_144 = arith.constant 16 : i32
    %286 = vector.broadcast %c16_i32_144 : i32 to vector<16x256xi32>
    %287 = arith.muli %286, %281 : vector<16x256xi32>
    %c16_i32_145 = arith.constant 16 : i32
    %288 = vector.broadcast %c16_i32_145 : i32 to vector<16x256xi32>
    %289 = arith.addi %287, %288 : vector<16x256xi32>
    %290 = arith.cmpi slt, %282, %289 : vector<16x256xi32>
    %291 = arith.andi %285, %290 : vector<16x256xi1>
    %292 = arith.extui %291 : vector<16x256xi1> to vector<16x256xi32>
    %293 = arith.sitofp %292 : vector<16x256xi32> to vector<16x256xf32>
    %cst_146 = arith.constant dense<0.000000e+00> : vector<16x256xf32>
    %294 = tpu.matmul %280, %293, %cst_146 {dimension_numbers = #tpu.dot_dimension_numbers<[1], [0], [0], [1], [0, 0, 1, 1], [], []>} : vector<16x16xf32>, vector<16x256xf32>, vector<16x256xf32> -> vector<16x256xf32>
    %295 = vector.extract_strided_slice %294 {offsets = [0, 0], sizes = [1, 256], strides = [1, 1]} : vector<16x256xf32> to vector<1x256xf32>
    %296 = vector.shape_cast %295 : vector<1x256xf32> to vector<1x256xf32>
    %297 = vector.broadcast %296 : vector<1x256xf32> to vector<16x256xf32>
    %c0_147 = arith.constant 0 : index
    %c0_148 = arith.constant 0 : index
    %c0_149 = arith.constant 0 : index
    %298 = vector.load %arg14[%c0_147, %c0_148, %c0_149] : memref<1x256x256xf32, #tpu.memory_space<vmem>>, vector<1x16x256xf32>
    %299 = vector.shape_cast %298 : vector<1x16x256xf32> to vector<16x256xf32>
    %300 = vector.shape_cast %297 : vector<16x256xf32> to vector<1x16x256xf32>
    tpu.vector_store %arg14[%c0_147, %c0_148, %c0_149], %300 {strides = array<i32>} : memref<1x256x256xf32, #tpu.memory_space<vmem>>, vector<1x16x256xf32>,
    %301 = vector.extract_strided_slice %294 {offsets = [1, 0], sizes = [1, 256], strides = [1, 1]} : vector<16x256xf32> to vector<1x256xf32>
    %302 = vector.shape_cast %301 : vector<1x256xf32> to vector<1x256xf32>
    %303 = vector.broadcast %302 : vector<1x256xf32> to vector<16x256xf32>
    %c0_150 = arith.constant 0 : index
    %c16_151 = arith.constant 16 : index
    %c0_152 = arith.constant 0 : index
    %304 = vector.load %arg14[%c0_150, %c16_151, %c0_152] : memref<1x256x256xf32, #tpu.memory_space<vmem>>, vector<1x16x256xf32>
    %305 = vector.shape_cast %304 : vector<1x16x256xf32> to vector<16x256xf32>
    %306 = vector.shape_cast %303 : vector<16x256xf32> to vector<1x16x256xf32>
    tpu.vector_store %arg14[%c0_150, %c16_151, %c0_152], %306 {strides = array<i32>} : memref<1x256x256xf32, #tpu.memory_space<vmem>>, vector<1x16x256xf32>,
    %307 = vector.extract_strided_slice %294 {offsets = [2, 0], sizes = [1, 256], strides = [1, 1]} : vector<16x256xf32> to vector<1x256xf32>
    %308 = vector.shape_cast %307 : vector<1x256xf32> to vector<1x256xf32>
    %309 = vector.broadcast %308 : vector<1x256xf32> to vector<16x256xf32>
    %c0_153 = arith.constant 0 : index
    %c32_154 = arith.constant 32 : index
    %c0_155 = arith.constant 0 : index
    %310 = vector.load %arg14[%c0_153, %c32_154, %c0_155] : memref<1x256x256xf32, #tpu.memory_space<vmem>>, vector<1x16x256xf32>
    %311 = vector.shape_cast %310 : vector<1x16x256xf32> to vector<16x256xf32>
    %312 = vector.shape_cast %309 : vector<16x256xf32> to vector<1x16x256xf32>
    tpu.vector_store %arg14[%c0_153, %c32_154, %c0_155], %312 {strides = array<i32>} : memref<1x256x256xf32, #tpu.memory_space<vmem>>, vector<1x16x256xf32>,
    %313 = vector.extract_strided_slice %294 {offsets = [3, 0], sizes = [1, 256], strides = [1, 1]} : vector<16x256xf32> to vector<1x256xf32>
    %314 = vector.shape_cast %313 : vector<1x256xf32> to vector<1x256xf32>
    %315 = vector.broadcast %314 : vector<1x256xf32> to vector<16x256xf32>
    %c0_156 = arith.constant 0 : index
    %c48 = arith.constant 48 : index
    %c0_157 = arith.constant 0 : index
    %316 = vector.load %arg14[%c0_156, %c48, %c0_157] : memref<1x256x256xf32, #tpu.memory_space<vmem>>, vector<1x16x256xf32>
    %317 = vector.shape_cast %316 : vector<1x16x256xf32> to vector<16x256xf32>
    %318 = vector.shape_cast %315 : vector<16x256xf32> to vector<1x16x256xf32>
    tpu.vector_store %arg14[%c0_156, %c48, %c0_157], %318 {strides = array<i32>} : memref<1x256x256xf32, #tpu.memory_space<vmem>>, vector<1x16x256xf32>,
    %319 = vector.extract_strided_slice %294 {offsets = [4, 0], sizes = [1, 256], strides = [1, 1]} : vector<16x256xf32> to vector<1x256xf32>
    %320 = vector.shape_cast %319 : vector<1x256xf32> to vector<1x256xf32>
    %321 = vector.broadcast %320 : vector<1x256xf32> to vector<16x256xf32>
    %c0_158 = arith.constant 0 : index
    %c64 = arith.constant 64 : index
    %c0_159 = arith.constant 0 : index
    %322 = vector.load %arg14[%c0_158, %c64, %c0_159] : memref<1x256x256xf32, #tpu.memory_space<vmem>>, vector<1x16x256xf32>
    %323 = vector.shape_cast %322 : vector<1x16x256xf32> to vector<16x256xf32>
    %324 = vector.shape_cast %321 : vector<16x256xf32> to vector<1x16x256xf32>
    tpu.vector_store %arg14[%c0_158, %c64, %c0_159], %324 {strides = array<i32>} : memref<1x256x256xf32, #tpu.memory_space<vmem>>, vector<1x16x256xf32>,
    %325 = vector.extract_strided_slice %294 {offsets = [5, 0], sizes = [1, 256], strides = [1, 1]} : vector<16x256xf32> to vector<1x256xf32>
    %326 = vector.shape_cast %325 : vector<1x256xf32> to vector<1x256xf32>
    %327 = vector.broadcast %326 : vector<1x256xf32> to vector<16x256xf32>
    %c0_160 = arith.constant 0 : index
    %c80 = arith.constant 80 : index
    %c0_161 = arith.constant 0 : index
    %328 = vector.load %arg14[%c0_160, %c80, %c0_161] : memref<1x256x256xf32, #tpu.memory_space<vmem>>, vector<1x16x256xf32>
    %329 = vector.shape_cast %328 : vector<1x16x256xf32> to vector<16x256xf32>
    %330 = vector.shape_cast %327 : vector<16x256xf32> to vector<1x16x256xf32>
    tpu.vector_store %arg14[%c0_160, %c80, %c0_161], %330 {strides = array<i32>} : memref<1x256x256xf32, #tpu.memory_space<vmem>>, vector<1x16x256xf32>,
    %331 = vector.extract_strided_slice %294 {offsets = [6, 0], sizes = [1, 256], strides = [1, 1]} : vector<16x256xf32> to vector<1x256xf32>
    %332 = vector.shape_cast %331 : vector<1x256xf32> to vector<1x256xf32>
    %333 = vector.broadcast %332 : vector<1x256xf32> to vector<16x256xf32>
    %c0_162 = arith.constant 0 : index
    %c96 = arith.constant 96 : index
    %c0_163 = arith.constant 0 : index
    %334 = vector.load %arg14[%c0_162, %c96, %c0_163] : memref<1x256x256xf32, #tpu.memory_space<vmem>>, vector<1x16x256xf32>
    %335 = vector.shape_cast %334 : vector<1x16x256xf32> to vector<16x256xf32>
    %336 = vector.shape_cast %333 : vector<16x256xf32> to vector<1x16x256xf32>
    tpu.vector_store %arg14[%c0_162, %c96, %c0_163], %336 {strides = array<i32>} : memref<1x256x256xf32, #tpu.memory_space<vmem>>, vector<1x16x256xf32>,
    %337 = vector.extract_strided_slice %294 {offsets = [7, 0], sizes = [1, 256], strides = [1, 1]} : vector<16x256xf32> to vector<1x256xf32>
    %338 = vector.shape_cast %337 : vector<1x256xf32> to vector<1x256xf32>
    %339 = vector.broadcast %338 : vector<1x256xf32> to vector<16x256xf32>
    %c0_164 = arith.constant 0 : index
    %c112 = arith.constant 112 : index
    %c0_165 = arith.constant 0 : index
    %340 = vector.load %arg14[%c0_164, %c112, %c0_165] : memref<1x256x256xf32, #tpu.memory_space<vmem>>, vector<1x16x256xf32>
    %341 = vector.shape_cast %340 : vector<1x16x256xf32> to vector<16x256xf32>
    %342 = vector.shape_cast %339 : vector<16x256xf32> to vector<1x16x256xf32>
    tpu.vector_store %arg14[%c0_164, %c112, %c0_165], %342 {strides = array<i32>} : memref<1x256x256xf32, #tpu.memory_space<vmem>>, vector<1x16x256xf32>,
    %343 = vector.extract_strided_slice %294 {offsets = [8, 0], sizes = [1, 256], strides = [1, 1]} : vector<16x256xf32> to vector<1x256xf32>
    %344 = vector.shape_cast %343 : vector<1x256xf32> to vector<1x256xf32>
    %345 = vector.broadcast %344 : vector<1x256xf32> to vector<16x256xf32>
    %c0_166 = arith.constant 0 : index
    %c128 = arith.constant 128 : index
    %c0_167 = arith.constant 0 : index
    %346 = vector.load %arg14[%c0_166, %c128, %c0_167] : memref<1x256x256xf32, #tpu.memory_space<vmem>>, vector<1x16x256xf32>
    %347 = vector.shape_cast %346 : vector<1x16x256xf32> to vector<16x256xf32>
    %348 = vector.shape_cast %345 : vector<16x256xf32> to vector<1x16x256xf32>
    tpu.vector_store %arg14[%c0_166, %c128, %c0_167], %348 {strides = array<i32>} : memref<1x256x256xf32, #tpu.memory_space<vmem>>, vector<1x16x256xf32>,
    %349 = vector.extract_strided_slice %294 {offsets = [9, 0], sizes = [1, 256], strides = [1, 1]} : vector<16x256xf32> to vector<1x256xf32>
    %350 = vector.shape_cast %349 : vector<1x256xf32> to vector<1x256xf32>
    %351 = vector.broadcast %350 : vector<1x256xf32> to vector<16x256xf32>
    %c0_168 = arith.constant 0 : index
    %c144 = arith.constant 144 : index
    %c0_169 = arith.constant 0 : index
    %352 = vector.load %arg14[%c0_168, %c144, %c0_169] : memref<1x256x256xf32, #tpu.memory_space<vmem>>, vector<1x16x256xf32>
    %353 = vector.shape_cast %352 : vector<1x16x256xf32> to vector<16x256xf32>
    %354 = vector.shape_cast %351 : vector<16x256xf32> to vector<1x16x256xf32>
    tpu.vector_store %arg14[%c0_168, %c144, %c0_169], %354 {strides = array<i32>} : memref<1x256x256xf32, #tpu.memory_space<vmem>>, vector<1x16x256xf32>,
    %355 = vector.extract_strided_slice %294 {offsets = [10, 0], sizes = [1, 256], strides = [1, 1]} : vector<16x256xf32> to vector<1x256xf32>
    %356 = vector.shape_cast %355 : vector<1x256xf32> to vector<1x256xf32>
    %357 = vector.broadcast %356 : vector<1x256xf32> to vector<16x256xf32>
    %c0_170 = arith.constant 0 : index
    %c160 = arith.constant 160 : index
    %c0_171 = arith.constant 0 : index
    %358 = vector.load %arg14[%c0_170, %c160, %c0_171] : memref<1x256x256xf32, #tpu.memory_space<vmem>>, vector<1x16x256xf32>
    %359 = vector.shape_cast %358 : vector<1x16x256xf32> to vector<16x256xf32>
    %360 = vector.shape_cast %357 : vector<16x256xf32> to vector<1x16x256xf32>
    tpu.vector_store %arg14[%c0_170, %c160, %c0_171], %360 {strides = array<i32>} : memref<1x256x256xf32, #tpu.memory_space<vmem>>, vector<1x16x256xf32>,
    %361 = vector.extract_strided_slice %294 {offsets = [11, 0], sizes = [1, 256], strides = [1, 1]} : vector<16x256xf32> to vector<1x256xf32>
    %362 = vector.shape_cast %361 : vector<1x256xf32> to vector<1x256xf32>
    %363 = vector.broadcast %362 : vector<1x256xf32> to vector<16x256xf32>
    %c0_172 = arith.constant 0 : index
    %c176 = arith.constant 176 : index
    %c0_173 = arith.constant 0 : index
    %364 = vector.load %arg14[%c0_172, %c176, %c0_173] : memref<1x256x256xf32, #tpu.memory_space<vmem>>, vector<1x16x256xf32>
    %365 = vector.shape_cast %364 : vector<1x16x256xf32> to vector<16x256xf32>
    %366 = vector.shape_cast %363 : vector<16x256xf32> to vector<1x16x256xf32>
    tpu.vector_store %arg14[%c0_172, %c176, %c0_173], %366 {strides = array<i32>} : memref<1x256x256xf32, #tpu.memory_space<vmem>>, vector<1x16x256xf32>,
    %367 = vector.extract_strided_slice %294 {offsets = [12, 0], sizes = [1, 256], strides = [1, 1]} : vector<16x256xf32> to vector<1x256xf32>
    %368 = vector.shape_cast %367 : vector<1x256xf32> to vector<1x256xf32>
    %369 = vector.broadcast %368 : vector<1x256xf32> to vector<16x256xf32>
    %c0_174 = arith.constant 0 : index
    %c192 = arith.constant 192 : index
    %c0_175 = arith.constant 0 : index
    %370 = vector.load %arg14[%c0_174, %c192, %c0_175] : memref<1x256x256xf32, #tpu.memory_space<vmem>>, vector<1x16x256xf32>
    %371 = vector.shape_cast %370 : vector<1x16x256xf32> to vector<16x256xf32>
    %372 = vector.shape_cast %369 : vector<16x256xf32> to vector<1x16x256xf32>
    tpu.vector_store %arg14[%c0_174, %c192, %c0_175], %372 {strides = array<i32>} : memref<1x256x256xf32, #tpu.memory_space<vmem>>, vector<1x16x256xf32>,
    %373 = vector.extract_strided_slice %294 {offsets = [13, 0], sizes = [1, 256], strides = [1, 1]} : vector<16x256xf32> to vector<1x256xf32>
    %374 = vector.shape_cast %373 : vector<1x256xf32> to vector<1x256xf32>
    %375 = vector.broadcast %374 : vector<1x256xf32> to vector<16x256xf32>
    %c0_176 = arith.constant 0 : index
    %c208 = arith.constant 208 : index
    %c0_177 = arith.constant 0 : index
    %376 = vector.load %arg14[%c0_176, %c208, %c0_177] : memref<1x256x256xf32, #tpu.memory_space<vmem>>, vector<1x16x256xf32>
    %377 = vector.shape_cast %376 : vector<1x16x256xf32> to vector<16x256xf32>
    %378 = vector.shape_cast %375 : vector<16x256xf32> to vector<1x16x256xf32>
    tpu.vector_store %arg14[%c0_176, %c208, %c0_177], %378 {strides = array<i32>} : memref<1x256x256xf32, #tpu.memory_space<vmem>>, vector<1x16x256xf32>,
    %379 = vector.extract_strided_slice %294 {offsets = [14, 0], sizes = [1, 256], strides = [1, 1]} : vector<16x256xf32> to vector<1x256xf32>
    %380 = vector.shape_cast %379 : vector<1x256xf32> to vector<1x256xf32>
    %381 = vector.broadcast %380 : vector<1x256xf32> to vector<16x256xf32>
    %c0_178 = arith.constant 0 : index
    %c224 = arith.constant 224 : index
    %c0_179 = arith.constant 0 : index
    %382 = vector.load %arg14[%c0_178, %c224, %c0_179] : memref<1x256x256xf32, #tpu.memory_space<vmem>>, vector<1x16x256xf32>
    %383 = vector.shape_cast %382 : vector<1x16x256xf32> to vector<16x256xf32>
    %384 = vector.shape_cast %381 : vector<16x256xf32> to vector<1x16x256xf32>
    tpu.vector_store %arg14[%c0_178, %c224, %c0_179], %384 {strides = array<i32>} : memref<1x256x256xf32, #tpu.memory_space<vmem>>, vector<1x16x256xf32>,
    %385 = vector.extract_strided_slice %294 {offsets = [15, 0], sizes = [1, 256], strides = [1, 1]} : vector<16x256xf32> to vector<1x256xf32>
    %386 = vector.shape_cast %385 : vector<1x256xf32> to vector<1x256xf32>
    %387 = vector.broadcast %386 : vector<1x256xf32> to vector<16x256xf32>
    %c0_180 = arith.constant 0 : index
    %c240 = arith.constant 240 : index
    %c0_181 = arith.constant 0 : index
    %388 = vector.load %arg14[%c0_180, %c240, %c0_181] : memref<1x256x256xf32, #tpu.memory_space<vmem>>, vector<1x16x256xf32>
    %389 = vector.shape_cast %388 : vector<1x16x256xf32> to vector<16x256xf32>
    %390 = vector.shape_cast %387 : vector<16x256xf32> to vector<1x16x256xf32>
    tpu.vector_store %arg14[%c0_180, %c240, %c0_181], %390 {strides = array<i32>} : memref<1x256x256xf32, #tpu.memory_space<vmem>>, vector<1x16x256xf32>,
    return
  }
  func.func @transform_0(%arg0: i32) -> (i32, i32, i32) {
    %c0_i32 = arith.constant 0 : i32
    %c0_i32_0 = arith.constant 0 : i32
    %c0_i32_1 = arith.constant 0 : i32
    return %arg0, %c0_i32, %c0_i32_0 : i32, i32, i32
  }
  func.func @transform_1(%arg0: i32) -> (i32, i32) {
    %c0_i32 = arith.constant 0 : i32
    %c0_i32_0 = arith.constant 0 : i32
    %c0_i32_1 = arith.constant 0 : i32
    return %c0_i32, %c0_i32_0 : i32, i32
  }
  func.func @transform_2(%arg0: i32) -> (i32, i32, i32) {
    %c0_i32 = arith.constant 0 : i32
    %c0_i32_0 = arith.constant 0 : i32
    %c0_i32_1 = arith.constant 0 : i32
    return %arg0, %c0_i32, %c0_i32_0 : i32, i32, i32
  }
  func.func @transform_3(%arg0: i32) -> (i32, i32) {
    %c0_i32 = arith.constant 0 : i32
    %c0_i32_0 = arith.constant 0 : i32
    %c0_i32_1 = arith.constant 0 : i32
    return %c0_i32, %c0_i32_0 : i32, i32
  }
  func.func @transform_4(%arg0: i32) -> (i32, i32) {
    %c0_i32 = arith.constant 0 : i32
    %c0_i32_0 = arith.constant 0 : i32
    %c0_i32_1 = arith.constant 0 : i32
    return %c0_i32, %c0_i32_0 : i32, i32
  }
  func.func @transform_5(%arg0: i32) -> (i32, i32, i32) {
    %c0_i32 = arith.constant 0 : i32
    %c0_i32_0 = arith.constant 0 : i32
    %c0_i32_1 = arith.constant 0 : i32
    %c0_i32_2 = arith.constant 0 : i32
    return %c0_i32, %c0_i32_0, %c0_i32_1 : i32, i32, i32
  }
  func.func @transform_6(%arg0: i32) -> (i32, i32) {
    %c0_i32 = arith.constant 0 : i32
    %c0_i32_0 = arith.constant 0 : i32
    %c0_i32_1 = arith.constant 0 : i32
    return %c0_i32, %c0_i32_0 : i32, i32
  }
  func.func @transform_7(%arg0: i32) -> (i32, i32) {
    %c0_i32 = arith.constant 0 : i32
    %c0_i32_0 = arith.constant 0 : i32
    %c0_i32_1 = arith.constant 0 : i32
    return %c0_i32, %c0_i32_0 : i32, i32
  }
  func.func @transform_8(%arg0: i32) -> (i32, i32) {
    %c0_i32 = arith.constant 0 : i32
    %c0_i32_0 = arith.constant 0 : i32
    %c0_i32_1 = arith.constant 0 : i32
    return %c0_i32, %c0_i32_0 : i32, i32
  }
  func.func @transform_9(%arg0: i32) -> (i32, i32) {
    %c0_i32 = arith.constant 0 : i32
    %c0_i32_0 = arith.constant 0 : i32
    %c0_i32_1 = arith.constant 0 : i32
    return %c0_i32, %c0_i32_0 : i32, i32
  }
  func.func @transform_10(%arg0: i32) -> (i32, i32) {
    %c0_i32 = arith.constant 0 : i32
    %c0_i32_0 = arith.constant 0 : i32
    %c0_i32_1 = arith.constant 0 : i32
    return %c0_i32, %c0_i32_0 : i32, i32
  }
  func.func @transform_11(%arg0: i32) -> (i32, i32) {
    %c0_i32 = arith.constant 0 : i32
    %c0_i32_0 = arith.constant 0 : i32
    %c0_i32_1 = arith.constant 0 : i32
    return %c0_i32, %c0_i32_0 : i32, i32
  }
  func.func @transform_12(%arg0: i32) -> (i32, i32) {
    %c0_i32 = arith.constant 0 : i32
    %c0_i32_0 = arith.constant 0 : i32
    %c0_i32_1 = arith.constant 0 : i32
    return %c0_i32, %c0_i32_0 : i32, i32
  }
  func.func @transform_13(%arg0: i32) -> (i32, i32, i32) {
    %c0_i32 = arith.constant 0 : i32
    %c0_i32_0 = arith.constant 0 : i32
    %c0_i32_1 = arith.constant 0 : i32
    return %arg0, %c0_i32, %c0_i32_0 : i32, i32, i32
  }
  func.func @transform_14(%arg0: i32) -> (i32, i32, i32) {
    %c0_i32 = arith.constant 0 : i32
    %c0_i32_0 = arith.constant 0 : i32
    %c0_i32_1 = arith.constant 0 : i32
    return %arg0, %c0_i32, %c0_i32_0 : i32, i32, i32
  }
}

</mosaic_0001>

<bundles_post_ra>
// kernel: idn_layer_forward.1
= control target key start
LH: loop header
LB: loop body
LE: loop exit
PB: predicated region body
PF: predicated region fallthrough
CT: control target
= control target key end

     0   :  { %s4081_s0 = inlined_call_operand.vmem [shape: f32[2,4,324], index: 0, kind: input, shape index: {}]   ;;  %s4082_s1 = inlined_call_operand.vmem [shape: f32[1,324], index: 1, kind: input, shape index: {}]   ;;  %s4083_s2 = inlined_call_operand.vmem [shape: f32[2,64,64], index: 2, kind: input, shape index: {}]   ;;  %s4084_s3 = inlined_call_operand.vmem [shape: f32[4,64], index: 3, kind: input, shape index: {}]   ;;  %s4085_s4 = inlined_call_operand.vmem [shape: f32[4,1], index: 4, kind: input, shape index: {}]   ;;  %s4086_s5 = inlined_call_operand.vmem [shape: f32[4,64,64], index: 5, kind: input, shape index: {}]   ;;  %s4087_s6 = inlined_call_operand.vmem [shape: f32[1,64], index: 6, kind: input, shape index: {}]   ;;  %s4088_s7 = inlined_call_operand.vmem [shape: f32[32,8], index: 7, kind: input, shape index: {}]   ;;  %s4089_s8 = inlined_call_operand.vmem [shape: f32[32,1], index: 8, kind: input, shape index: {}]   ;;  %s4090_s9 = inlined_call_operand.vmem [shape: f32[4,36], index: 9, kind: input, shape index: {}]   ;;  %s4091_s10 = inlined_call_operand.vmem [shape: f32[4,1], index: 10, kind: input, shape index: {}]   ;;  %s4092_s11 = inlined_call_operand.vmem [shape: f32[1,36], index: 11, kind: input, shape index: {}]   ;;  %s4093_s12 = inlined_call_operand.<no memory space> [shape: f32[1,1], index: 12, kind: input, shape index: {}]   ;;  %s4094_s13 = inlined_call_operand.hbm [shape: f32[2,256,256], index: 13, kind: output, shape index: {0}]   ;;  %s4095_s14 = inlined_call_operand.vmem [shape: f32[2,32,1], index: 14, kind: output, shape index: {1}]  }
   0x1   :  { %4125 = sst [smem:[#allocation10_spill]] %s4085_s4  ;;  %v20_v0 = vstv %s4093_s12 }
   0x2   :  { %21 = vst [vmem:[#allocation4] sm:$0x1] %v20_v0 }
   0x3   :  { %22 = vsyncpa [#allocation6], 0 }
   0x4   :  { %24 = vsyncpa [#allocation6 + $0x1], 0  ;;  %s3329_s15 = smov 0   ;;  %s3331_s16 = smov 0  }
   0x5   :  { %s3333_s17 = smov 0   ;;  %s3335_s18 = smov 0  }
   0x6 LB: > { %4126 = sst [smem:[#allocation8_spill]] %s3221_s17  ;;  %s3350_s12 = sadd.s32 4294967295, %s3225_s18   ;;  %s3225_s18 = sphi %s3335_s18, %s4168_s18   ;;  %s3221_s17 = sphi %s3333_s17, %s4167_s17   ;;  %s3217_s16 = sphi %s3331_s16, %s4166_s16   ;;  %s3213_s15 = sphi %s3329_s15, %s4165_s15  }
   0x7   : > { %s2693_s19 = sadd.s32 4294967294, %s3225_s18   ;;  %s3354_s20 = sadd.s32 1, %s3225_s18  }
   0x8   : > { %s320_s21 = sadd.s32 1, %s3221_s17  ;;  %s317_s22 = ssub.s32 %s3225_s18, %s3354_s20 }
   0x9   : > { %p330_p0 = scmp.ne.s32.totalorder %s3221_s17, %s3217_s16  ;;  %p318_p1 = scmp.eq.s32.totalorder %s317_s22, 0 }
   0xa   : > { %p331_p2 = scmp.eq.s32.totalorder %s3350_s12, 1  ;;  %p336_p3 = scmp.ne.s32.totalorder %s3217_s16, %s3213_s15 }
   0xb   : > { %p337_p4 = scmp.eq.s32.totalorder %s2693_s19, 1  ;;  %p2696_p7 = scmp.ge.s32.totalorder %s3225_s18, 1 }
   0xc   : > { %s3365_s23 = scalar_select %p318_p1, %s3221_s17, %s320_s21  }
   0xd   : > { %p3367_p5 = por %p331_p2, %p330_p0  ;;  %p3371_p6 = por %p337_p4, %p336_p3 }
   0xe   : > { %4127 = sst [smem:[#allocation9_spill]] %s3365_s23  ;;  %p430_p8 = scmp.lt.s32.totalorder %s3225_s18, 3 }
  0x10   : > { %p431_p9 = pnand %p2696_p7, %p430_p8 }
  0x11   : > { %p486_p10 = scmp.lt.s32.totalorder (!%p431_p9), %s3350_s12, 1  ;;  %v3227_v1 = vmov (!%p431_p9), 0.0|0.0   ;;  %vm4123_vm0 = vmmov (!%p431_p9), 0   ;;  %v3229_v2 = vmov (!%p431_p9), 0.0   ;;  %s4130_s4 = sld [smem:[#allocation10_spill]] (!%p431_p9)  ;;  %v3230_v4 = vmov (!%p431_p9), 0  }
  0x12   : > { %434 = sbr.rel (%p431_p9) target bundleno = 3959 (0xf77), region = 72  ;;  %2974 = vmatprep.subr.bf16.mxu0 (!%p431_p9), %v3227_v1  ;;  %2853 = vmatprep.mubr.msk.f32.mxu0 (!%p431_p9), %vm4123_vm0, %v3229_v2  ;;  %v594_v5 = vld [vmem:[%s4086_s5] sm:$0xff] (!%p431_p9)  ;;  %v595_v6 = vld [vmem:[%s4086_s5 + $0x8] sm:$0xff] (!%p431_p9)  ;;  %v596_v7 = vld [vmem:[%s4086_s5 + $0x10] sm:$0xff] (!%p431_p9)  ;;  %vm516_vm1 = vcmask (!%p431_p9), 523264   ;;  %vm993_vm2 = vcmask (!%p431_p9), 1043456  }
  0x13   : > { %3140 = vset.pattern.permute.xlu0 (!%p431_p9), %v3230_v4  ;;  %2986 = vmatprep.subr.bf16.mxu1 (!%p431_p9), %v3227_v1  ;;  %v2987_v8 = vpack.c.bf16 (!%p431_p9), %v595_v6, %v594_v5  ;;  %v597_v9 = vld [vmem:[%s4086_s5 + $0x18] sm:$0xff] (!%p431_p9)  ;;  %v598_v11 = vld [vmem:[%s4086_s5 + $0x20] sm:$0xff] (!%p431_p9)  ;;  %v599_v12 = vld [vmem:[%s4086_s5 + $0x28] sm:$0xff] (!%p431_p9)  ;;  %vm997_vm3 = vcmask (!%p431_p9), 551936   ;;  %vm930_vm6 = vcmask (!%p431_p9), 122880   ;;  %s3233_s17 = smov (!%p431_p9), 96  }
  0x14   : > { %2872 = vmatprep.mubr.msk.f32.mxu1 (!%p431_p9), %vm4123_vm0, %v3229_v2  ;;  %3141 = vset.pattern.permute.xlu1 (!%p431_p9), %v3230_v4  ;;  %v2990_v10 = vpack.c.bf16 (!%p431_p9), %v597_v9, %v596_v7  ;;  %v2993_v19 = vpack.c.bf16 (!%p431_p9), %v599_v12, %v598_v11  ;;  %v509_v26 = vld [vmem:[%s4084_s3] sm:$0xf] (!%p431_p9)  ;;  %v600_v27 = vld [vmem:[%s4086_s5 + $0x30] sm:$0xff] (!%p431_p9)  ;;  %v601_v28 = vld [vmem:[%s4086_s5 + $0x38] sm:$0xff] (!%p431_p9)  ;;  %s3234_s26 = smov (!%p431_p9), 80   ;;  %s4121_s30 = smov (!%p431_p9), 19  }
  0x15   : > { %2988 = vmatpush3.bf16.msra.mxu1 (!%p431_p9), %v2987_v8  ;;  %v2996_v29 = vpack.c.bf16 (!%p431_p9), %v601_v28, %v600_v27  ;;  %v2705_v40 = vld [vmem:[%s4086_s5 + $0x40] sm:$0xff] (!%p431_p9)  ;;  %v2706_v41 = vld [vmem:[%s4086_s5 + $0x48] sm:$0xff] (!%p431_p9)  ;;  %v2707_v46 = vld [vmem:[%s4086_s5 + $0x50] sm:$0xff] (!%p431_p9)  ;;  %s3236_s21 = smov (!%p431_p9), 124   ;;  %s4101_s27 = smov (!%p431_p9), 110  }
  0x16   : > { %2989 = vmatprep.subr.bf16.mxu1 (!%p431_p9), %v3227_v1  ;;  %v2999_v45 = vpack.c.bf16 (!%p431_p9), %v2706_v41, %v2705_v40  ;;  %v2708_v47 = vld [vmem:[%s4086_s5 + $0x58] sm:$0xff] (!%p431_p9)  ;;  %v2709_v50 = vld [vmem:[%s4086_s5 + $0x60] sm:$0xff] (!%p431_p9)  ;;  %v2710_v51 = vld [vmem:[%s4086_s5 + $0x68] sm:$0xff] (!%p431_p9)  ;;  %s4099_s29 = smov (!%p431_p9), 127   ;;  %s4097_s23 = smov (!%p431_p9), 126  }
  0x17   : > { %v510_v3 = vld [vmem:[%s4130_s4] sm:$0xf] (!%p431_p9)  ;;  %v3002_v49 = vpack.c.bf16 (!%p431_p9), %v2708_v47, %v2707_v46  ;;  %v3005_v52 = vpack.c.bf16 (!%p431_p9), %v2710_v51, %v2709_v50  ;;  %v2711_v53 = vld [vmem:[%s4086_s5 + $0x70] sm:$0xff] (!%p431_p9)  ;;  %v2712_v54 = vld [vmem:[%s4086_s5 + $0x78] sm:$0xff] (!%p431_p9) }
  0x18   : > { %513 = vperm.xlu0 (!%p431_p9), %3140, %v510_v3   ;;  %v3008_v55 = vpack.c.bf16 (!%p431_p9), %v2712_v54, %v2711_v53  ;;  %v2714_v56 = vld [vmem:[%s4086_s5 + $0x80] sm:$0xff] (!%p431_p9)  ;;  %v2715_v57 = vld [vmem:[%s4086_s5 + $0x88] sm:$0xff] (!%p431_p9)  ;;  %v2716_v60 = vld [vmem:[%s4086_s5 + $0x90] sm:$0xff] (!%p431_p9) }
  0x19   : > { %s3385_s28 = scalar_select %p486_p10, %s3350_s12, 1  ;;  %2991 = vmatpush3.bf16.msra.mxu1 %v2990_v10  ;;  %v3011_v58 = vpack.c.bf16 %v2715_v57, %v2714_v56  ;;  %v2717_v61 = vld [vmem:[%s4086_s5 + $0x98] sm:$0xff]  ;;  %v2718_v63 = vld [vmem:[%s4086_s5 + $0xa0] sm:$0xff]  ;;  %v2719_v0 = vld [vmem:[%s4086_s5 + $0xa8] sm:$0xff] }
  0x1a   : > { %2992 = vmatprep.subr.bf16.mxu1 %v3227_v1  ;;  %v3014_v62 = vpack.c.bf16 %v2717_v61, %v2716_v60  ;;  %v3017_v3 = vpack.c.bf16 %v2719_v0, %v2718_v63  ;;  %v2720_v5 = vld [vmem:[%s4086_s5 + $0xb0] sm:$0xff]  ;;  %v2721_v6 = vld [vmem:[%s4086_s5 + $0xb8] sm:$0xff]  ;;  %v2723_v8 = vld [vmem:[%s4086_s5 + $0xc0] sm:$0xff] }
  0x1b   : > { %s2767_s4 = sshll.u32 %s3385_s28, 6  ;;  %v3020_v7 = vpack.c.bf16 %v2721_v6, %v2720_v5  ;;  %v2724_v9 = vld [vmem:[%s4086_s5 + $0xc8] sm:$0xff]  ;;  %v2725_v12 = vld [vmem:[%s4086_s5 + $0xd0] sm:$0xff] }
  0x1c   : > { %s495_s19 = scalar_lea.vmem %s4083_s2, %s2767_s4  ;;  %v3023_v10 = vpack.c.bf16 %v2724_v9, %v2723_v8  ;;  %s3231_s4 = smov 112  }
  0x1d   : > { %v501_v13 = vld [vmem:[%s495_s19] sm:$0xff]  ;;  %v502_v14 = vld [vmem:[%s495_s19 + $0x8] sm:$0xff]  ;;  %v503_v15 = vld [vmem:[%s495_s19 + $0x10] sm:$0xff]  ;;  %2994 = vmatpush3.bf16.msra.mxu1 %v2993_v19 }
  0x1e   : > { %v2975_v16 = vpack.c.bf16 %v502_v14, %v501_v13  ;;  %v504_v17 = vld [vmem:[%s495_s19 + $0x18] sm:$0xff]  ;;  %v505_v20 = vld [vmem:[%s495_s19 + $0x20] sm:$0xff]  ;;  %v506_v21 = vld [vmem:[%s495_s19 + $0x28] sm:$0xff]  ;;  %2995 = vmatprep.subr.bf16.mxu1 %v3227_v1 }
  0x1f   : > { %v2978_v18 = vpack.c.bf16 %v504_v17, %v503_v15  ;;  %v2981_v22 = vpack.c.bf16 %v506_v21, %v505_v20  ;;  %v507_v23 = vld [vmem:[%s495_s19 + $0x30] sm:$0xff]  ;;  %v508_v24 = vld [vmem:[%s495_s19 + $0x38] sm:$0xff]  ;;  %s3077_s19 = smul.u32 12, %s3385_s28  ;;  %v2727_v15 = vld [vmem:[%s4086_s5 + $0xe0] sm:$0xff] }
  0x20   : > { %2976 = vmatpush3.bf16.msra.mxu0 %v2975_v16  ;;  %v2984_v25 = vpack.c.bf16 %v508_v24, %v507_v23  ;;  %v2726_v13 = vld [vmem:[%s4086_s5 + $0xd8] sm:$0xff]  ;;  %v2728_v16 = vld [vmem:[%s4086_s5 + $0xe8] sm:$0xff]  ;;  %v593_v24 = vld [vmem:[%s4087_s6] sm:$0x1] }
  0x21   : > { %2977 = vmatprep.subr.bf16.mxu0 %v3227_v1  ;;  %2997 = vmatpush3.bf16.msra.mxu1 %v2996_v29  ;;  %s490_s22 = scalar_lea.vmem %s4081_s0, %s3077_s19  ;;  %v3026_v14 = vpack.c.bf16 %v2726_v13, %v2725_v12  ;;  %v3029_v17 = vpack.c.bf16 %v2728_v16, %v2727_v15  ;;  %v2730_v19 = vld [vmem:[%s4086_s5 + $0xf8] sm:$0xff]  ;;  %s4103_s19 = smov 109  }
  0x22   : > { %2998 = vmatprep.subr.bf16.mxu1 %v3227_v1  ;;  %v3435_v30 = vld [vmem:[%s490_s22] sm:$0xff]  ;;  %v3437_v31 = vld [vmem:[%s490_s22 + $0x8] sm:$0xf]  ;;  %s4115_s22 = smov 92  }
  0x23   : > { %v991_v32 = vcombine.high %v3435_v30, %v3435_v30  ;;  %v994_v33 = vsel %vm993_vm2, %v3435_v30, 0.0  ;;  %v998_v35 = vsel %vm997_vm3, %v3437_v31, 0.0 }
  0x24   : > { %2979 = vmatpush3.bf16.msra.mxu0 %v2978_v18  ;;  %v2729_v18 = vld [vmem:[%s4086_s5 + $0xf0] sm:$0xff] }
  0x25   : > { %2980 = vmatprep.subr.bf16.mxu0 %v3227_v1  ;;  %v995_v34 = vsel %vm993_vm2, %v991_v32, 0.0  ;;  %v3032_v20 = vpack.c.bf16 %v2730_v19, %v2729_v18 }
  0x26   : > { %v996_v36 = vadd.f32 %v995_v34, %v994_v33 }
  0x28   : > { %2982 = vmatpush3.bf16.msra.mxu0 %v2981_v22  ;;  %v999_v37 = vadd.f32 %v998_v35, %v996_v36  ;;  %v928_v22 = vlaneseq  ;;  %v3232_v35 = vmov 839922192  }
  0x29   : > { %2983 = vmatprep.subr.bf16.mxu0 %v3227_v1  ;;  %v1005_v36 = vunpack.c.l.s4 %v3232_v35 }
  0x2a   : > { %v3547_v23 = vshrl.u32 %v928_v22, 7 }
  0x2c   : > { %2985 = vmatpush3.bf16.msra.mxu0 %v2984_v25  ;;  %v3553_v28 = vsub.s32 0, %v3547_v23  ;;  %v3570_v46 = vsub.s32 2, %v3547_v23  ;;  %vm4108_vm13 = vcmp.eq.s32.totalorder %v3547_v23, 0  ;;  %vm4107_vm14 = vcmp.eq.s32.totalorder %v3547_v23, 1 }
  0x2d   : > { %vm4106_vm15 = vcmp.eq.s32.totalorder %v3547_v23, 2 }
  0x2f   : > { %2854 = vmatmul.mubr.msk.f32.vlgmr.msra.gmra.mrb[0].mxu0 %vm516_vm1, %v509_v26 }
  0x37   : > { %1000 = vadd.xlane.f32.xlu0 %v999_v37  ;;  %v1006_v37 = vunpack.c.0.s8 %v1005_v36 }
  0x39   : > { %v3561_v40 = vsub.s32 %v1006_v37, %v3547_v23 }
  0x97   : > { %v514_v38 = vpop.permute.xlu0 %513 }
 0x102   : > { %v586_v39 = vpop.f32.mrb[0].mxu0 }
 0x103   : > { %v587_v42 = vadd.f32 %v586_v39, %v514_v38  ;;  %v2855_v43 = vpop.f32.mrb[1].mxu0  ;;  %v1001_v38 = vpop.xlane.xlu0 %1000  ;;  %v988_v39 = vld [vmem:[%s4082_s1] sm:$0x7] }
 0x104   : > { %v1002_v41 = vmul.f32 0.00390625, %v1001_v38  ;;  %vm989_vm7 = vcmp.gt.f32.partialorder %v988_v39, 0.5  ;;  %v3565_v43 = vsub.s32 1, %v3547_v23 }
 0x105   : > { %vm590_vm4 = vcmp.gt.f32.partialorder %v587_v42, 0.0  ;;  %v591_v44 = vmul.f32 0.1, %v587_v42 }
 0x107   : > { %v3458_v48 = vsel %vm590_vm4, %v587_v42, %v591_v44  ;;  %v1010_v42 = vrot.slane %v1002_v41, %v3561_v40  ;;  %v1014_v44 = vsel %vm989_vm7, 1, %v3230_v4  ;;  %vm1319_vm4 = vcmask 1043608  }
 0x108   : > { %2873 = vmatmul.mubr.msk.f32.vlgmr.msra.gmra.mrb[0].mxu1 %vm516_vm1, %v3458_v48  ;;  %v685_v59 = vrot.slane %v3458_v48, 1  ;;  %v768_v11 = vrot.slane %v3458_v48, 2  ;;  %v851_v21 = vrot.slane %v3458_v48, 3  ;;  %v1018_v47 = vrot.slane %v1014_v44, %v3553_v28 }
 0x109   : > { %3000 = vmatpush3.bf16.msra.mxu1 %v2999_v45  ;;  %2891 = vmatprep.mubr.msk.f32.mxu1 %vm4123_vm0, %v3229_v2  ;;  %v1012_v45 = vsub.f32 %v3435_v30, %v1010_v42  ;;  %v1022_v48 = vrot.slane %v1014_v44, %v3565_v43  ;;  %v1026_v50 = vrot.slane %v1014_v44, %v3570_v46 }
 0x10a   : > { %3001 = vmatprep.subr.bf16.mxu1 %v3227_v1  ;;  %vm3575_vm8 = vcmp.eq.s32.totalorder %v1018_v47, 1  ;;  %v1013_v4 = vsub.f32 %v3437_v31, %v1010_v42 }
 0x10b   : > { %vm3579_vm9 = vcmp.eq.s32.totalorder %v1022_v48, 1  ;;  %v1033_v53 = vsel %vm3575_vm8, %v1012_v45, 0.0  ;;  %vm3588_vm10 = vcmp.eq.s32.totalorder %v1026_v50, 1 }
 0x10c   : > { %v1036_v56 = vmul.f32 %v1033_v53, %v1033_v53  ;;  %v3648_v53 = vld [vmem:[%s4088_s7 + $0x10] sm:$0xff] }
 0x10d   : > { %3003 = vmatpush3.bf16.msra.mxu1 %v3002_v49  ;;  %v1031_v49 = vcombine.high %v1012_v45, %v1012_v45 }
 0x10e   : > { %3004 = vmatprep.subr.bf16.mxu1 %v3227_v1  ;;  %v1039_v60 = vsel %vm993_vm2, %v1036_v56, 0.0 }
 0x10f   : > { %v1034_v54 = vsel %vm3579_vm9, %v1031_v49, 0.0 }
 0x110   : > { %v1037_v57 = vmul.f32 %v1034_v54, %v1034_v54 }
 0x111   : > { %3006 = vmatpush3.bf16.msra.mxu1 %v3005_v52 }
 0x112   : > { %3007 = vmatprep.subr.bf16.mxu1 %v3227_v1  ;;  %v1040_v61 = vsel %vm993_vm2, %v1037_v57, 0.0 }
 0x115   : > { %3009 = vmatpush3.bf16.msra.mxu1 %v3008_v55 }
 0x116   : > { %3010 = vmatprep.subr.bf16.mxu1 %v3227_v1 }
 0x118   : > { %2892 = vmatmul.mubr.msk.f32.vlgmr.msra.gmra.mrb[0].mxu1 %vm516_vm1, %v685_v59 }
 0x119   : > { %3012 = vmatpush3.bf16.msra.mxu1 %v3011_v58  ;;  %2910 = vmatprep.mubr.msk.f32.mxu1 %vm4123_vm0, %v3229_v2  ;;  %v1035_v58 = vsel %vm3588_vm10, %v1013_v4, 0.0  ;;  %v3641_v4 = vld [vmem:[%s4088_s7] sm:$0xff] }
 0x11a   : > { %3013 = vmatprep.subr.bf16.mxu1 %v3227_v1  ;;  %v1038_v59 = vmul.f32 %v1035_v58, %v1035_v58 }
 0x11c   : > { %v1042_v63 = vsel %vm997_vm3, %v1038_v59, 0.0 }
 0x11d   : > { %3015 = vmatpush3.bf16.msra.mxu1 %v3014_v62  ;;  %v1041_v62 = vadd.f32 %v1040_v61, %v1039_v60 }
 0x11e   : > { %3016 = vmatprep.subr.bf16.mxu1 %v3227_v1 }
 0x11f   : > { %v1043_v0 = vadd.f32 %v1042_v63, %v1041_v62 }
 0x121   : > { %3018 = vmatpush3.bf16.msra.mxu1 %v3017_v3 }
 0x122   : > { %3019 = vmatprep.subr.bf16.mxu1 %v3227_v1 }
 0x125   : > { %3021 = vmatpush3.bf16.msra.mxu1 %v3020_v7 }
 0x126   : > { %3022 = vmatprep.subr.bf16.mxu1 %v3227_v1 }
 0x128   : > { %2911 = vmatmul.mubr.msk.f32.vlgmr.msra.gmra.mrb[0].mxu1 %vm516_vm1, %v768_v11 }
 0x129   : > { %3024 = vmatpush3.bf16.msra.mxu1 %v3023_v10  ;;  %2929 = vmatprep.mubr.msk.f32.mxu1 %vm4123_vm0, %v3229_v2 }
 0x12a   : > { %3025 = vmatprep.subr.bf16.mxu1 %v3227_v1 }
 0x12d   : > { %3027 = vmatpush3.bf16.msra.mxu1 %v3026_v14 }
 0x12e   : > { %3028 = vmatprep.subr.bf16.mxu1 %v3227_v1 }
 0x131   : > { %3030 = vmatpush3.bf16.msra.mxu1 %v3029_v17 }
 0x132   : > { %3031 = vmatprep.subr.bf16.mxu1 %v3227_v1 }
 0x135   : > { %3033 = vmatpush3.bf16.msra.mxu1 %v3032_v20 }
 0x138   : > { %2930 = vmatmul.mubr.msk.f32.vlgmr.msra.gmra.mrb[0].mxu1 %vm516_vm1, %v851_v21  ;;  %vm4105_vm1 = vcmp.eq.s32.totalorder %v3547_v23, 3 }
 0x139   : > { %2367 = vmatprep.mubr.f32.mxu1 %v3229_v2 }
 0x20b   : > { %v920_v25 = vpop.f32.mrb[0].mxu1 }
 0x20c   : > { %v3066_v26 = vadd.f32 %v920_v25, %v593_v24  ;;  %v2931_v27 = vpop.f32.mrb[1].mxu1 }
 0x20e   : > { %v926_v29 = vmul.f32 0.1, %v3066_v26  ;;  %vm925_vm5 = vcmp.gt.f32.partialorder %v3066_v26, 0.0 }
 0x210   : > { %v927_v32 = vsel %vm925_vm5, %v3066_v26, %v926_v29  ;;  %vm1320_vm5 = vcmask 1047556  }
 0x211   : > { %v931_v33 = vsel %vm930_vm6, %v927_v32, 0.0  ;;  %v946_v34 = vrot.slane %v927_v32, %v3553_v28  ;;  %vm3652_vm7 = vmor %vm1320_vm5, %vm1319_vm4  ;;  %vm4109_vm4 = vcmask 1031168   ;;  %vm4110_vm5 = vcmask 1039360  }
 0x212   : > { %932 = vadd.xlane.f32.xlu0 %v931_v33 }
 0x213   : > { %947 = vrot.lane.b32.xlu1 %v946_v34, %s3231_s4  ;;  %s4119_s4 = smov 108  }
 0x217   : > { %960 = vrot.lane.b32.xlu1 %v946_v34, %s3233_s17  ;;  %s4117_s17 = smov 91  }
 0x21b   : > { %973 = vrot.lane.b32.xlu1 %v946_v34, %s3234_s26  ;;  %s4145_s26 = smov 109  }
 0x23f   : > { %1044 = vadd.xlane.f32.xlu1 %v1043_v0 }
 0x285   : > { %v948_v3 = vpop.permute.xlu1 %947 }
 0x286   : > { %v950_v5 = vsel %vm930_vm6, %v948_v3, 0.0 }
 0x287   : > { %951 = vadd.xlane.f32.xlu0 %v950_v5 }
 0x289   : > { %v961_v6 = vpop.permute.xlu1 %960 }
 0x28a   : > { %v963_v7 = vsel %vm930_vm6, %v961_v6, 0.0 }
 0x28b   : > { %964 = vadd.xlane.f32.xlu0 %v963_v7 }
 0x28d   : > { %v974_v8 = vpop.permute.xlu1 %973 }
 0x28e   : > { %v976_v9 = vsel %vm930_vm6, %v974_v8, 0.0  ;;  %vm1314_vm6 = vcmask 154624  }
 0x28f   : > { %977 = vadd.xlane.f32.xlu0 %v976_v9 }
 0x29f   : > { %v933_v17 = vpop.xlane.xlu0 %932 }
 0x2a0   : > { %v935_v19 = vmul.f32 0.0625, %v933_v17 }
 0x2a2   : > { %v940_v26 = vrot.slane %v935_v19, %v3553_v28 }
 0x2a4   : > { %v941_v34 = vsel %vm4108_vm13, %v940_v26, 0.0  ;;  %vm4111_vm13 = vcmask 744448  }
 0x2cc   : > { %v1045_v10 = vpop.xlane.xlu1 %1044 }
 0x2cd   : > { %v1046_v11 = vmul.f32 0.003921569, %v1045_v10 }
 0x2cf   : > { %3159 = vrsqrt.f32 %v1046_v11  ;;  %vm1049_vm11 = vcmp.eq.f32.partialorder %v1046_v11, inf  ;;  %v1052_v13 = vand.u32 2147483648, %v1046_v11  ;;  %vm1051_vm12 = vcmp.eq.f32.partialorder %v1046_v11, 0.0 }
 0x2d9   : > { %v3160_v12 = vpop.eup %3159 }
 0x2da   : > { %v1048_v14 = vmul.f32 %v3160_v12, %v1046_v11 }
 0x2dc   : > { %v1050_v15 = vsel %vm1049_vm11, %v1046_v11, %v1048_v14  ;;  %vm1323_vm11 = vcmask 707584   ;;  %v3689_v14 = vld [vmem:[%s4088_s7 + $0x18] sm:$0xff] }
 0x2dd   : > { %v1053_v16 = vsel %vm1051_vm12, %v1052_v13, %v1050_v15  ;;  %vm1070_vm12 = vcmask 31744  }
 0x2de   : > { %2932 = vmatprep.subr.msk.mxu0 %vm993_vm2, %v1053_v16  ;;  %v1292_v20 = vrot.slane %v1053_v16, %v3561_v40 }
 0x2df   : > { %2933 = vmatpush3.msk.msra.mxu0 %vm993_vm2, %v1053_v16  ;;  %v1304_v16 = vld [vmem:[%s4091_s10] sm:$0xf] }
 0x2e0   : > { %3161 = vrcp.f32 %v1292_v20 }
 0x2ea   : > { %v3162_v44 = vpop.eup %3161 }
 0x314   : > { %v952_v18 = vpop.xlane.xlu0 %951 }
 0x315   : > { %v953_v21 = vmul.f32 0.0625, %v952_v18 }
 0x317   : > { %v958_v27 = vrot.slane %v953_v21, %v3553_v28 }
 0x318   : > { %v965_v24 = vpop.xlane.xlu0 %964 }
 0x319   : > { %v966_v25 = vmul.f32 0.0625, %v965_v24  ;;  %v959_v35 = vsel %vm4107_vm14, %v958_v27, %v941_v34  ;;  %vm1428_vm14 = vcmask 883712  }
 0x31b   : > { %v971_v29 = vrot.slane %v966_v25, %v3553_v28 }
 0x31c   : > { %v978_v32 = vpop.xlane.xlu0 %977 }
 0x31d   : > { %v979_v33 = vmul.f32 0.0625, %v978_v32  ;;  %v972_v37 = vsel %vm4106_vm15, %v971_v29, %v959_v35  ;;  %vm1353_vm15 = vcmask 556036  }
 0x31f   : > { %v984_v36 = vrot.slane %v979_v33, %v3553_v28 }
 0x321   : > { %v985_v38 = vsel %vm4105_vm1, %v984_v36, %v972_v37  ;;  %vm1387_vm1 = vcmask 900096  }
 0x322   : > { %2940 = vmatprep.subr.msk.mxu0 %vm993_vm2, %v985_v38  ;;  %v1282_v39 = vrot.slane %v985_v38, %v3561_v40 }
 0x324   : > { %v1284_v41 = vsub.f32 %v3435_v30, %v1282_v39  ;;  %v1285_v42 = vsub.f32 %v3437_v31, %v1282_v39  ;;  %v3633_v30 = vld [vmem:[%s4088_s7 + $0x8] sm:$0xff] }
 0x326   : > { %v1296_v45 = vmul.f32 %v3162_v44, %v1285_v42  ;;  %v1295_v47 = vmul.f32 %v3162_v44, %v1284_v41 }
 0x328   : > { %v1302_v48 = vsel %vm3588_vm10, %v1296_v45, 0.0  ;;  %v1298_v49 = vcombine.high %v1295_v47, %v1295_v47  ;;  %v1300_v50 = vsel %vm3575_vm8, %v1295_v47, 0.0 }
 0x329   : > { %1311 = vrot.lane.b32.xlu0 %v1302_v48, %s4121_s30 }
 0x32a   : > { %v1301_v40 = vsel %vm3579_vm9, %v1298_v49, 0.0 }
 0x32b   : > { %v1308_v31 = vcombine.low %v1300_v50, %v1301_v40 }
 0x32d   : > { %1309 = vrot.lane.b32.xlu1 %v1308_v31, %s4121_s30  ;;  %1064 = vrot.lane.b32.xlu0 %v3633_v30, %s3236_s21  ;;  %s4139_s30 = smov 19  }
 0x331   : > { %1062 = vrot.lane.b32.xlu1 %v3641_v4, %s3236_s21 }
 0x335   : > { %1066 = vrot.lane.b32.xlu1 %v3648_v53, %s3236_s21 }
 0x39b   : > { %v1312_v54 = vpop.permute.xlu0 %1311 }
 0x39f   : > { %v1310_v56 = vpop.permute.xlu1 %1309  ;;  %v1065_v61 = vpop.permute.xlu0 %1064 }
 0x3a0   : > { %v1313_v58 = vrot.slane %v1310_v56, 4 }
 0x3a2   : > { %v1315_v59 = vsel %vm1314_vm6, %v1313_v58, %v1310_v56  ;;  %v1316_v60 = vsel %vm1314_vm6, %v1313_v58, %v1312_v54 }
 0x3a3   : > { %1322 = vst.msk [vmem:[#allocation2] sm:$0xff] %vm3652_vm7, %v1315_v59  ;;  %v1063_v62 = vpop.permute.xlu1 %1062 }
 0x3a4   : > { %1324 = vst.msk [vmem:[#allocation2 + $0x8] sm:$0xf] %vm1323_vm11, %v1316_v60  ;;  %2934 = vmatprep.mubr.msk.f32.mxu0 %vm1070_vm12, %v1063_v62 }
 0x3a5   : > { %2935 = vmatmul.mubr.msk.f32.vlgmr.msra.gmra.mrb[2].mxu0 %vm1070_vm12, %v1065_v61 }
 0x3a6   : > { %2941 = vmatpush3.msk.msra.mxu0 %vm993_vm2, %v985_v38 }
 0x3a7   : > { %v1067_v63 = vpop.permute.xlu1 %1066 }
 0x3a8   : > { %2937 = vmatprep.mubr.msk.f32.mxu0 %vm1070_vm12, %v1067_v63 }
 0x3aa   : > { %v1325_v0 = vld [vmem:[#allocation2] sm:$0xff] }
 0x3ab   : > { %v1326_v3 = vld [vmem:[#allocation2 + $0x8] sm:$0xf]  ;;  %v1328_v5 = vcombine.high %v1325_v0, %v1325_v0  ;;  %1330 = vst [vmem:[#allocation3] sm:$0xf] %v1325_v0  ;;  %1383 = vrot.lane.b32.xlu0 %v1325_v0, %s4101_s27  ;;  %1341 = vrot.lane.b32.xlu1 %v1325_v0, %s4099_s29  ;;  %v1337_v9 = vcombine.low %v1325_v0, %v1325_v0 }
 0x3ac   : > { %1332 = vst.msk [vmem:[#allocation3 + $0x10] sm:$0xf] %vm997_vm3, %v1326_v3  ;;  %v1397_v6 = vld [vmem:[#allocation2 + $0x8] sm:$0xf] }
 0x3ad   : > { %1331 = vst [vmem:[#allocation3 + $0x8] sm:$0xf] %v1328_v5  ;;  %v1356_v7 = vld [vmem:[#allocation2 + $0x8] sm:$0xf] }
 0x3ae   : > { %v1438_v8 = vld [vmem:[#allocation2 + $0x8] sm:$0xf] }
 0x3af   : > { %1405 = vrot.lane.b32.xlu0 %v1397_v6, %s4103_s19  ;;  %1364 = vrot.lane.b32.xlu1 %v1356_v7, %s4097_s23  ;;  %v3149_v10 = vld [vmem:[#allocation2 + $0x8] ss:$0 sps:$4 sm:$0xff]  }
 0x3b0   : > { %v3150_v11 = vld [vmem:[#allocation2 + $0x8] ss:$0 sps:$4 sm:$0xff]  }
 0x3b1   : > { %v3151_v12 = vld [vmem:[#allocation2 + $0x8] ss:$0 sps:$4 sm:$0xff]  }
 0x3b2   : > { %v3152_v13 = vld [vmem:[#allocation2 + $0x8] ss:$0 sps:$4 sm:$0xff]  }
 0x3b3   : > { %1446 = vrot.lane.b32.xlu0 %v1438_v8, %s4115_s22  ;;  %1360 = vrot.lane.b32.xlu1 %v1325_v0, %s4097_s23  ;;  %v1479_v15 = vld [vmem:[#allocation2 + $0x8] sm:$0xf] }
 0x3b7   : > { %1362 = vrot.lane.b32.xlu0 %v1328_v5, %s4097_s23  ;;  %1424 = vrot.lane.b32.xlu1 %v1325_v0, %s4119_s4 }
 0x3bb   : > { %1465 = vrot.lane.b32.xlu1 %v1325_v0, %s4117_s17  ;;  %1339 = vrot.lane.b32.xlu0 %v1337_v9, %s4099_s29 }
 0x3bf   : > { %1401 = vrot.lane.b32.xlu1 %v1325_v0, %s4103_s19  ;;  %1381 = vrot.lane.b32.xlu0 %v1337_v9, %s4101_s27 }
 0x3c3   : > { %1442 = vrot.lane.b32.xlu1 %v1325_v0, %s4115_s22  ;;  %1426 = vrot.lane.b32.xlu0 %v3149_v10, %s4119_s4 }
 0x3c7   : > { %1343 = vrot.lane.b32.xlu1 %v3150_v11, %s4099_s29  ;;  %1467 = vrot.lane.b32.xlu0 %v3151_v12, %s4117_s17  ;;  %s4113_s29 = smov 90  }
 0x3cb   : > { %1385 = vrot.lane.b32.xlu1 %v3152_v13, %s4101_s27  ;;  %1422 = vrot.lane.b32.xlu0 %v1337_v9, %s4119_s4  ;;  %s4142_s4 = smov 108   ;;  %s4147_s27 = smov 90  }
 0x3cf   : > { %1403 = vrot.lane.b32.xlu1 %v1328_v5, %s4103_s19  ;;  %1463 = vrot.lane.b32.xlu0 %v1337_v9, %s4117_s17  ;;  %s2768_s19 = sshll.u32 %s3385_s28, 5  ;;  %s3245_s28 = smov 18  }
 0x3d0   : > { %s500_s17 = scalar_lea.vmem %s4095_s14, %s2768_s19  ;;  %s4144_s19 = smov 91  }
 0x3d3   : > { %1444 = vrot.lane.b32.xlu1 %v1328_v5, %s4115_s22  ;;  %1068 = vrot.lane.b32.xlu0 %v3689_v14, %s3236_s21  ;;  %s4141_s22 = smov 127   ;;  %s4146_s21 = smov 92  }
 0x3d7   : > { %1485 = vrot.lane.b32.xlu1 %v1328_v5, %s4113_s29  ;;  %1487 = vrot.lane.b32.xlu0 %v1479_v15, %s4113_s29 }
 0x3db   : > { %1483 = vrot.lane.b32.xlu1 %v1325_v0, %s4113_s29  ;;  %1515 = vperm.xlu0 %3140, %v1304_v16   ;;  %s4140_s29 = smov 126  }
 0x41d   : > { %v1384_v17 = vpop.permute.xlu0 %1383  ;;  %v1342_v18 = vpop.permute.xlu1 %1341 }
 0x421   : > { %v1406_v19 = vpop.permute.xlu0 %1405  ;;  %v1365_v20 = vpop.permute.xlu1 %1364 }
 0x422   : > { %1415 = vst.msk [vmem:[#allocation3 + $0x40] sm:$0xf] %vm997_vm3, %v1406_v19  ;;  %1374 = vst.msk [vmem:[#allocation3 + $0x28] sm:$0xf] %vm997_vm3, %v1365_v20 }
 0x425   : > { %v1447_v21 = vpop.permute.xlu0 %1446  ;;  %v1361_v24 = vpop.permute.xlu1 %1360 }
 0x426   : > { %1456 = vst.msk [vmem:[#allocation3 + $0x58] sm:$0xf] %vm997_vm3, %v1447_v21 }
 0x429   : > { %v1363_v25 = vpop.permute.xlu0 %1362  ;;  %v1425_v26 = vpop.permute.xlu1 %1424 }
 0x42a   : > { %v1367_v27 = vsel %vm4109_vm4, %v1361_v24, %v1363_v25  ;;  %v1368_v29 = vsel %vm4109_vm4, %v1363_v25, %v1365_v20  ;;  %vm1407_vm4 = vcmask 891904   ;;  %v1303_v20 = vld [vmem:[%s4090_s9] sm:$0xf] }
 0x42b   : > { %1372 = vst [vmem:[#allocation3 + $0x18] sm:$0xf] %v1367_v27  ;;  %1373 = vst [vmem:[#allocation3 + $0x20] sm:$0xf] %v1368_v29 }
 0x42d   : > { %v1340_v32 = vpop.permute.xlu0 %1339  ;;  %v1466_v33 = vpop.permute.xlu1 %1465 }
 0x42e   : > { %v1346_v34 = vsel %vm4110_vm5, %v1340_v32, %v1342_v18  ;;  %v1264_v32 = vld [vmem:[%s4089_s8 + $0x8] sm:$0xff] }
 0x42f   : > { %1351 = vst [vmem:[#allocation3] sm:$0xf0] %v1346_v34 }
 0x431   : > { %v1382_v35 = vpop.permute.xlu0 %1381  ;;  %v1402_v36 = vpop.permute.xlu1 %1401 }
 0x432   : > { %v1388_v37 = vsel %vm1387_vm1, %v1382_v35, %v1384_v17 }
 0x433   : > { %1393 = vst [vmem:[#allocation3 + $0x18] sm:$0xf0] %v1388_v37 }
 0x435   : > { %v1427_v38 = vpop.permute.xlu0 %1426  ;;  %v1443_v39 = vpop.permute.xlu1 %1442 }
 0x436   : > { %v1430_v41 = vsel %vm1428_vm14, %v1425_v26, %v1427_v38  ;;  %1436 = vst.msk [vmem:[#allocation3 + $0x40] sm:$0xf0] %vm1353_vm15, %v1427_v38  ;;  %v1498_v7 = vld [vmem:[#allocation3] sm:$0xff]  ;;  %v1266_v38 = vld [vmem:[%s4089_s8 + $0x18] sm:$0xff] }
 0x437   : > { %1435 = vst [vmem:[#allocation3 + $0x38] sm:$0xf0] %v1430_v41 }
 0x439   : > { %v1468_v42 = vpop.permute.xlu0 %1467  ;;  %v1344_v44 = vpop.permute.xlu1 %1343 }
 0x43a   : > { %v1471_v45 = vsel %vm4111_vm13, %v1466_v33, %v1468_v42  ;;  %1477 = vst.msk [vmem:[#allocation3 + $0x58] sm:$0xf0] %vm1353_vm15, %v1468_v42  ;;  %v1347_v47 = vsel %vm4110_vm5, %v1342_v18, %v1344_v44  ;;  %1354 = vst.msk [vmem:[#allocation3 + $0x10] sm:$0xf0] %vm1353_vm15, %v1344_v44  ;;  %vm1448_vm5 = vcmask 752640   ;;  %v1501_v5 = vld [vmem:[#allocation3 + $0x18] sm:$0xff] }
 0x43b   : > { %1476 = vst [vmem:[#allocation3 + $0x50] sm:$0xf0] %v1471_v45  ;;  %1352 = vst [vmem:[#allocation3 + $0x8] sm:$0xf0] %v1347_v47  ;;  %v3036_v10 = vpack.c.bf16 %v1501_v5, %v1498_v7 }
 0x43d   : > { %v1423_v48 = vpop.permute.xlu0 %1422  ;;  %v1386_v49 = vpop.permute.xlu1 %1385 }
 0x43e   : > { %v1429_v50 = vsel %vm1428_vm14, %v1423_v48, %v1425_v26  ;;  %v1389_v40 = vsel %vm1387_vm1, %v1384_v17, %v1386_v49  ;;  %1395 = vst.msk [vmem:[#allocation3 + $0x28] sm:$0xf0] %vm1353_vm15, %v1386_v49  ;;  %v1506_v26 = vld [vmem:[#allocation3 + $0x40] sm:$0xff] }
 0x43f   : > { %1434 = vst [vmem:[#allocation3 + $0x30] sm:$0xf0] %v1429_v50  ;;  %1394 = vst [vmem:[#allocation3 + $0x20] sm:$0xf0] %v1389_v40 }
 0x441   : > { %v1464_v31 = vpop.permute.xlu0 %1463  ;;  %v1404_v54 = vpop.permute.xlu1 %1403  ;;  %v1509_v25 = vld [vmem:[#allocation3 + $0x58] sm:$0xff] }
 0x442   : > { %v1470_v56 = vsel %vm4111_vm13, %v1464_v31, %v1466_v33  ;;  %v1408_v58 = vsel %vm1407_vm4, %v1402_v36, %v1404_v54  ;;  %v1409_v59 = vsel %vm1407_vm4, %v1404_v54, %v1406_v19  ;;  %v1499_v0 = vld [vmem:[#allocation3 + $0x8] sm:$0xff]  ;;  %vm4112_vm13 = vcmask 736256   ;;  %v1263_v33 = vld [vmem:[%s4089_s8] sm:$0xff] }
 0x443   : > { %1475 = vst [vmem:[#allocation3 + $0x48] sm:$0xf0] %v1470_v56  ;;  %1413 = vst [vmem:[#allocation3 + $0x30] sm:$0xf] %v1408_v58  ;;  %v3046_v27 = vpack.c.bf16 %v1509_v25, %v1506_v26 }
 0x444   : > { %1414 = vst [vmem:[#allocation3 + $0x38] sm:$0xf] %v1409_v59 }
 0x445   : > { %v1069_v60 = vpop.permute.xlu0 %1068  ;;  %v1445_v61 = vpop.permute.xlu1 %1444 }
 0x446   : > { %v1449_v62 = vsel %vm1448_vm5, %v1443_v39, %v1445_v61  ;;  %v1450_v63 = vsel %vm1448_vm5, %v1445_v61, %v1447_v21  ;;  %2938 = vmatmul.mubr.msk.f32.gmra.mrb[4].mxu0 %vm1070_vm12, %v1069_v60  ;;  %v1502_v3 = vld [vmem:[#allocation3 + $0x20] sm:$0xff]  ;;  %v1500_v21 = vld [vmem:[#allocation3 + $0x10] sm:$0xff] }
 0x447   : > { %1454 = vst [vmem:[#allocation3 + $0x48] sm:$0xf] %v1449_v62  ;;  %1455 = vst [vmem:[#allocation3 + $0x50] sm:$0xf] %v1450_v63  ;;  %2942 = vmatprep.mubr.msk.f32.mxu0 %vm1070_vm12, %v3641_v4  ;;  %v3034_v6 = vpack.c.bf16 %v1502_v3, %v1499_v0  ;;  %v1265_v39 = vld [vmem:[%s4089_s8 + $0x10] sm:$0xff] }
 0x449   : > { %v1488_v8 = vpop.permute.xlu0 %1487  ;;  %v1486_v9 = vpop.permute.xlu1 %1485  ;;  %3035 = vmatprep.subr.bf16.mxu0 %v3034_v6 }
 0x44a   : > { %1497 = vst.msk [vmem:[#allocation3 + $0x70] sm:$0xf] %vm997_vm3, %v1488_v8  ;;  %v1491_v11 = vsel %vm4112_vm13, %v1486_v9, %v1488_v8  ;;  %2943 = vmatmul.mubr.msk.f32.vlgmr.msra.gmra.mrb[2].mxu0 %vm1070_vm12, %v3633_v30  ;;  %v1504_v16 = vld [vmem:[#allocation3 + $0x30] sm:$0xff] }
 0x44b   : > { %1496 = vst [vmem:[#allocation3 + $0x68] sm:$0xf] %v1491_v11  ;;  %3037 = vmatpush1.bf16.msra.mxu0 %v3036_v10  ;;  %2945 = vmatprep.mubr.msk.f32.mxu0 %vm1070_vm12, %v3648_v53  ;;  %v1505_v12 = vld [vmem:[#allocation3 + $0x38] sm:$0xff]  ;;  %v1503_v53 = vld [vmem:[#allocation3 + $0x28] sm:$0xff] }
 0x44c   : > { %v3043_v24 = vpack.c.bf16 %v1503_v53, %v1500_v21 }
 0x44d   : > { %v1484_v4 = vpop.permute.xlu1 %1483 }
 0x44e   : > { %v1490_v13 = vsel %vm4112_vm13, %v1484_v4, %v1486_v9  ;;  %2946 = vmatmul.mubr.msk.f32.gmra.mrb[4].mxu0 %vm1070_vm12, %v3689_v14  ;;  %v1508_v15 = vld [vmem:[#allocation3 + $0x50] sm:$0xff]  ;;  %v1507_v17 = vld [vmem:[#allocation3 + $0x48] sm:$0xff]  ;;  %vm4124_vm13 = vcmask 293888   ;;  %vm1271_vm12 = vcmask 7168  }
 0x44f   : > { %1495 = vst [vmem:[#allocation3 + $0x60] sm:$0xf] %v1490_v13  ;;  %v3038_v18 = vpack.c.bf16 %v1508_v15, %v1505_v12  ;;  %v3040_v19 = vpack.c.bf16 %v1507_v17, %v1504_v16  ;;  %1595 = vmatprep.mubr.f32.mxu0 %v3229_v2 }
 0x451   : > { %3039 = vmatprep.subr.bf16.mxu0 %v3038_v18  ;;  %v1512_v29 = vld [vmem:[#allocation3 + $0x70] sm:$0xf] }
 0x452   : > { %3041 = vmatpush1.bf16.msra.mxu0 %v3040_v19  ;;  %v1511_v30 = vld [vmem:[#allocation3 + $0x68] sm:$0xf] }
 0x453   : > { %2742 = vmatprep.subr.msk.mxu0 %vm993_vm2, %v1511_v30  ;;  %v1685_v30 = vld [vmem:[#allocation4] sm:$0x1] }
 0x456   : > { %v1510_v14 = vld [vmem:[#allocation3 + $0x60] sm:$0xf] }
 0x457   : > { %2743 = vmatpush1.msk.msra.mxu0 %vm993_vm2, %v1510_v14 }
 0x458   : > { %2744 = vmatmul.mubr.msk.f32.vlgmr.msra.gmra.mrb[6].mxu0 %vm4124_vm13, %v1303_v20  ;;  %3042 = vmatprep.subr.bf16.mxu0 %v3227_v1 }
 0x459   : > { %3044 = vmatpush3.bf16.msra.mxu0 %v3043_v24  ;;  %2958 = vmatprep.mubr.msk.f32.mxu0 %vm4123_vm0, %v3229_v2 }
 0x45a   : > { %3045 = vmatprep.subr.bf16.mxu0 %v3227_v1  ;;  %v1516_v47 = vpop.permute.xlu0 %1515 }
 0x45d   : > { %3047 = vmatpush3.bf16.msra.mxu0 %v3046_v27 }
 0x45e   : > { %2956 = vmatprep.subr.mxu0 %v3229_v2 }
 0x461   : > { %2957 = vmatpush3.msk.msra.mxu0 %vm993_vm2, %v1512_v29 }
 0x462   : > { %2959 = vmatmul.mubr.msk.f32.vlgmr.msra.gmra.mrb[8].mxu0 %vm4124_vm13, %v1303_v20 }
 0x463   : > { %1965 = vmatprep.mubr.f32.mxu0 %v3229_v2 }
 0x51d   : > { %v2944_v34 = vpop.f32.mrb[2].mxu0 }
 0x51e   : > { %v1268_v35 = vadd.f32 %v2944_v34, %v1264_v32  ;;  %v1244_v36 = vpop.f32.mrb[3].mxu0 }
 0x51f   : > { %v1267_v37 = vadd.f32 %v1263_v33, %v1244_v36 }
 0x520   : > { %1273 = vst.msk [vmem:[%s500_s17 + $0x8] sm:$0xff] %vm1271_vm12, %v1268_v35 }
 0x521   : > { %1272 = vst.msk [vmem:[%s500_s17] sm:$0xff] %vm1271_vm12, %v1267_v37  ;;  %v2947_v41 = vpop.f32.mrb[4].mxu0 }
 0x522   : > { %v1270_v42 = vadd.f32 %v2947_v41, %v1266_v38  ;;  %v1254_v44 = vpop.f32.mrb[5].mxu0 }
 0x523   : > { %v1269_v45 = vadd.f32 %v1265_v39, %v1254_v44 }
 0x524   : > { %1275 = vst.msk [vmem:[%s500_s17 + $0x18] sm:$0xff] %vm1271_vm12, %v1270_v42 }
 0x525   : > { %1274 = vst.msk [vmem:[%s500_s17 + $0x10] sm:$0xff] %vm1271_vm12, %v1269_v45  ;;  %s4143_s17 = smov 110  }
 0x52b   : > { %v1597_v48 = vpop.f32.mrb[6].mxu0 }
 0x52c   : > { %v1598_v49 = vadd.f32 %v1597_v48, %v1516_v47  ;;  %v1599_v50 = vpop.f32.mrb[7].mxu0 }
 0x52d   : > { %v1600_v40 = vadd.f32 %v1599_v50, %v1516_v47 }
 0x52e   : > { %vm1672_vm0 = vcmp.gt.f32.partialorder %v1598_v49, 0.0  ;;  %v1675_v31 = vmul.f32 0.1, %v1598_v49 }
 0x52f   : > { %vm1673_vm13 = vcmp.gt.f32.partialorder %v1600_v40, 0.0  ;;  %v1676_v54 = vmul.f32 0.1, %v1600_v40 }
 0x530   : > { %v1678_v56 = vsel %vm1672_vm0, %v1598_v49, %v1675_v31  ;;  %vm4148_vm0 = vcmask 1031168  }
 0x531   : > { %v1679_v58 = vsel %vm1673_vm13, %v1600_v40, %v1676_v54  ;;  %v1681_v59 = vsel %vm3575_vm8, %v1678_v56, 0.0  ;;  %vm4149_vm8 = vcmask 1039360   ;;  %vm4152_vm13 = vcmask 744448  }
 0x532   : > { %v1682_v60 = vsel %vm3579_vm9, %v1679_v58, 0.0  ;;  %vm4150_vm9 = vmmov %vm4148_vm0 }
 0x533   : > { %v1689_v61 = vcombine.low %v1681_v59, %v1682_v60 }
 0x535   : > { %v1668_v62 = vpop.f32.mrb[8].mxu0  ;;  %1690 = vrot.lane.b32.xlu1 %v1689_v61, %s4139_s30 }
 0x536   : > { %v1669_v63 = vadd.f32 %v1668_v62, %v1516_v47  ;;  %v2960_v0 = vpop.f32.mrb[9].mxu0 }
 0x538   : > { %v1677_v3 = vmul.f32 0.1, %v1669_v63  ;;  %vm1674_vm12 = vcmp.gt.f32.partialorder %v1669_v63, 0.0 }
 0x53a   : > { %v1680_v5 = vsel %vm1674_vm12, %v1669_v63, %v1677_v3  ;;  %vm4162_vm12 = vcmp.eq.s32.totalorder %v3547_v23, 3 }
 0x53b   : > { %v1683_v6 = vsel %vm3588_vm10, %v1680_v5, 0.0  ;;  %vm4151_vm10 = vmmov %vm4149_vm8 }
 0x53c   : > { %1692 = vrot.lane.b32.xlu0 %v1683_v6, %s4139_s30  ;;  %s3248_s30 = smov [#allocation5]  }
 0x5a7   : > { %v1691_v7 = vpop.permute.xlu1 %1690 }
 0x5a8   : > { %v1694_v51 = vrot.slane %v1691_v7, 4 }
 0x5aa   : > { %v1695_v8 = vsel %vm1314_vm6, %v1694_v51, %v1691_v7 }
 0x5ab   : > { %1699 = vst.msk [vmem:[#allocation2] sm:$0xff] %vm3652_vm7, %v1695_v8 }
 0x5ae   : > { %v1693_v52 = vpop.permute.xlu0 %1692 }
 0x5af   : > { %v1696_v9 = vsel %vm1314_vm6, %v1694_v51, %v1693_v52 }
 0x5b0   : > { %1700 = vst.msk [vmem:[#allocation2 + $0x8] sm:$0xf] %vm1323_vm11, %v1696_v9 }
 0x5b2   : > { %v1729_v10 = vld [vmem:[#allocation2] sm:$0xff] }
 0x5b3   : > { %1734 = vrot.lane.b32.xlu0 %v1729_v10, %s4140_s29  ;;  %v1733_v11 = vcombine.high %v1729_v10, %v1729_v10  ;;  %1717 = vrot.lane.b32.xlu1 %v1729_v10, %s4141_s22  ;;  %1706 = vst [vmem:[#allocation3] sm:$0xf] %v1729_v10  ;;  %v1713_v57 = vcombine.low %v1729_v10, %v1729_v10 }
 0x5b5   : > { %1707 = vst [vmem:[#allocation3 + $0x8] sm:$0xf] %v1733_v11 }
 0x5b7   : > { %1795 = vrot.lane.b32.xlu0 %v1729_v10, %s4142_s4  ;;  %1756 = vrot.lane.b32.xlu1 %v1729_v10, %s4143_s17  ;;  %v1702_v55 = vld [vmem:[#allocation2 + $0x8] sm:$0xf] }
 0x5b8   : > { %1708 = vst.msk [vmem:[#allocation3 + $0x10] sm:$0xf] %vm997_vm3, %v1702_v55  ;;  %v1730_v4 = vld [vmem:[#allocation2 + $0x8] sm:$0xf] }
 0x5b9   : > { %v1769_v12 = vld [vmem:[#allocation2 + $0x8] sm:$0xf] }
 0x5ba   : > { %v3155_v13 = vld [vmem:[#allocation2 + $0x8] ss:$0 sps:$4 sm:$0xff]  }
 0x5bb   : > { %1834 = vrot.lane.b32.xlu0 %v1729_v10, %s4144_s19  ;;  %1736 = vrot.lane.b32.xlu1 %v1733_v11, %s4140_s29  ;;  %v1808_v15 = vld [vmem:[#allocation2 + $0x8] sm:$0xf] }
 0x5bc   : > { %v3156_v16 = vld [vmem:[#allocation2 + $0x8] ss:$0 sps:$4 sm:$0xff]  }
 0x5bd   : > { %v3157_v17 = vld [vmem:[#allocation2 + $0x8] ss:$0 sps:$4 sm:$0xff]  }
 0x5be   : > { %v3158_v18 = vld [vmem:[#allocation2 + $0x8] ss:$0 sps:$4 sm:$0xff]  }
 0x5bf   : > { %1773 = vrot.lane.b32.xlu0 %v1729_v10, %s4145_s26  ;;  %1715 = vrot.lane.b32.xlu1 %v1713_v57, %s4141_s22  ;;  %v1847_v19 = vld [vmem:[#allocation2 + $0x8] sm:$0xf] }
 0x5c3   : > { %1775 = vrot.lane.b32.xlu0 %v1733_v11, %s4145_s26  ;;  %1754 = vrot.lane.b32.xlu1 %v1713_v57, %s4143_s17 }
 0x5c7   : > { %1814 = vrot.lane.b32.xlu0 %v1733_v11, %s4146_s21  ;;  %1793 = vrot.lane.b32.xlu1 %v1713_v57, %s4142_s4 }
 0x5cb   : > { %1738 = vrot.lane.b32.xlu0 %v1730_v4, %s4140_s29  ;;  %1777 = vrot.lane.b32.xlu1 %v1769_v12, %s4145_s26  ;;  %s3247_s29 = smov 95  }
 0x5cf   : > { %1719 = vrot.lane.b32.xlu0 %v3155_v13, %s4141_s22  ;;  %1816 = vrot.lane.b32.xlu1 %v1808_v15, %s4146_s21  ;;  %s476_s22 = sand.u32 1, %s3217_s16  }
 0x5d3   : > { %1758 = vrot.lane.b32.xlu0 %v3156_v16, %s4143_s17  ;;  %1797 = vrot.lane.b32.xlu1 %v3157_v17, %s4142_s4  ;;  %s2697_s4 = sshll.u32 %s476_s22, 9 }
 0x5d4   : > { %s3939_s17 = scalar_lea.vmem [#allocation5], %s2697_s4 }
 0x5d5   : > { %s2591_s26 = sshll.u32 %s3939_s17, 4  ;;  %s4008_s26 = int_to_ptr.vmem [resolvable:$true] %s2591_s26 }
 0x5d6   : > { %s3163_s23 = scalar_lea.vmem %s4008_s26, 8192 }
 0x5d7   : > { %1812 = vrot.lane.b32.xlu0 %v1729_v10, %s4146_s21  ;;  %1836 = vrot.lane.b32.xlu1 %v3158_v18, %s4144_s19  ;;  %v1684_v18 = vld [vmem:[%s4092_s11] sm:$0x1]  ;;  %p3164_p11 = scmp.ne.s32.totalorder %s4008_s26, %s3163_s23 }
 0x5d9   : > { %p3165_p12 = pnand %p3164_p11, %p3367_p5 }
 0x5db   : > { %1853 = vrot.lane.b32.xlu0 %v1733_v11, %s4147_s27  ;;  %1832 = vrot.lane.b32.xlu1 %v1713_v57, %s4144_s19  ;;  %s2769_s19 = sshll.u32 %s3350_s12, 13  ;;  %p3166_p13 = pneg %p3165_p12 }
 0x5df   : > { %1851 = vrot.lane.b32.xlu0 %v1729_v10, %s4147_s27  ;;  %1855 = vrot.lane.b32.xlu1 %v1847_v19, %s4147_s27  ;;  %s4006_s27 = scalar_lea.hbm %s4094_s13, %s2769_s19 }
 0x5e3   : > { %1882 = vperm.xlu1 %3141, %v1685_v30  }
 0x5e7   : > { %2064 = vrot.lane.b32.xlu1 %v3229_v2, %s3245_s28 }
 0x625   : > { %v1735_v53 = vpop.permute.xlu0 %1734  ;;  %v1718_v20 = vpop.permute.xlu1 %1717 }
 0x629   : > { %v1796_v14 = vpop.permute.xlu0 %1795  ;;  %v1757_v21 = vpop.permute.xlu1 %1756 }
 0x62d   : > { %v1835_v24 = vpop.permute.xlu0 %1834  ;;  %v1737_v25 = vpop.permute.xlu1 %1736 }
 0x62e   : > { %v1740_v26 = vsel %vm4148_vm0, %v1735_v53, %v1737_v25  ;;  %vm2092_vm0 = vcmp.eq.s32.totalorder %v3547_v23, 4 }
 0x62f   : > { %1745 = vst [vmem:[#allocation3 + $0x18] sm:$0xf] %v1740_v26 }
 0x631   : > { %v1774_v27 = vpop.permute.xlu0 %1773  ;;  %v1716_v29 = vpop.permute.xlu1 %1715 }
 0x632   : > { %v1721_v32 = vsel %vm4149_vm8, %v1716_v29, %v1718_v20  ;;  %vm2104_vm8 = vcmp.eq.s32.totalorder %v3547_v23, 5 }
 0x633   : > { %1726 = vst [vmem:[#allocation3] sm:$0xf0] %v1721_v32 }
 0x635   : > { %v1776_v33 = vpop.permute.xlu0 %1775  ;;  %v1755_v34 = vpop.permute.xlu1 %1754 }
 0x636   : > { %v1779_v35 = vsel %vm1407_vm4, %v1774_v27, %v1776_v33  ;;  %v1760_v36 = vsel %vm1387_vm1, %v1755_v34, %v1757_v21 }
 0x637   : > { %1784 = vst [vmem:[#allocation3 + $0x30] sm:$0xf] %v1779_v35  ;;  %1765 = vst [vmem:[#allocation3 + $0x18] sm:$0xf0] %v1760_v36 }
 0x639   : > { %v1815_v37 = vpop.permute.xlu0 %1814  ;;  %v1794_v38 = vpop.permute.xlu1 %1793 }
 0x63a   : > { %v1799_v39 = vsel %vm1428_vm14, %v1794_v38, %v1796_v14  ;;  %v1865_v51 = vld [vmem:[#allocation3] sm:$0xff] }
 0x63b   : > { %1804 = vst [vmem:[#allocation3 + $0x30] sm:$0xf0] %v1799_v39 }
 0x63d   : > { %v1739_v41 = vpop.permute.xlu0 %1738  ;;  %v1778_v42 = vpop.permute.xlu1 %1777 }
 0x63e   : > { %v1741_v44 = vsel %vm4150_vm9, %v1737_v25, %v1739_v41  ;;  %1747 = vst.msk [vmem:[#allocation3 + $0x28] sm:$0xf] %vm997_vm3, %v1739_v41  ;;  %v1780_v45 = vsel %vm1407_vm4, %v1776_v33, %v1778_v42  ;;  %1786 = vst.msk [vmem:[#allocation3 + $0x40] sm:$0xf] %vm997_vm3, %v1778_v42  ;;  %v1868_v0 = vld [vmem:[#allocation3 + $0x18] sm:$0xff]  ;;  %vm4160_vm4 = vcmp.eq.s32.totalorder %v3547_v23, 1 }
 0x63f   : > { %1746 = vst [vmem:[#allocation3 + $0x20] sm:$0xf] %v1741_v44  ;;  %1785 = vst [vmem:[#allocation3 + $0x38] sm:$0xf] %v1780_v45  ;;  %v3050_v8 = vpack.c.bf16 %v1868_v0, %v1865_v51 }
 0x641   : > { %v1720_v47 = vpop.permute.xlu0 %1719  ;;  %v1817_v48 = vpop.permute.xlu1 %1816 }
 0x642   : > { %v1722_v49 = vsel %vm4151_vm10, %v1718_v20, %v1720_v47  ;;  %1728 = vst.msk [vmem:[#allocation3 + $0x10] sm:$0xf0] %vm1353_vm15, %v1720_v47  ;;  %v1819_v50 = vsel %vm1448_vm5, %v1815_v37, %v1817_v48  ;;  %v1871_v12 = vld [vmem:[#allocation3 + $0x30] sm:$0xff]  ;;  %vm2116_vm10 = vcmp.eq.s32.totalorder %v3547_v23, 6 }
 0x643   : > { %1825 = vst.msk [vmem:[#allocation3 + $0x58] sm:$0xf] %vm997_vm3, %v1817_v48  ;;  %1727 = vst [vmem:[#allocation3 + $0x8] sm:$0xf0] %v1722_v49 }
 0x644   : > { %1824 = vst [vmem:[#allocation3 + $0x50] sm:$0xf] %v1819_v50 }
 0x645   : > { %v1759_v40 = vpop.permute.xlu0 %1758  ;;  %v1798_v31 = vpop.permute.xlu1 %1797 }
 0x646   : > { %v1761_v54 = vsel %vm1387_vm1, %v1757_v21, %v1759_v40  ;;  %1767 = vst.msk [vmem:[#allocation3 + $0x28] sm:$0xf0] %vm1353_vm15, %v1759_v40  ;;  %v1800_v56 = vsel %vm1428_vm14, %v1796_v14, %v1798_v31  ;;  %1806 = vst.msk [vmem:[#allocation3 + $0x40] sm:$0xf0] %vm1353_vm15, %v1798_v31  ;;  %vm4154_vm14 = vcmask 736256  }
 0x647   : > { %1766 = vst [vmem:[#allocation3 + $0x20] sm:$0xf0] %v1761_v54  ;;  %1805 = vst [vmem:[#allocation3 + $0x38] sm:$0xf0] %v1800_v56 }
 0x648   : > { %vm4153_vm1 = vmmov %vm4152_vm13 }
 0x649   : > { %v1813_v58 = vpop.permute.xlu0 %1812  ;;  %v1837_v59 = vpop.permute.xlu1 %1836  ;;  %vm4155_vm6 = vmmov %vm4154_vm14  ;;  %v1867_v30 = vld [vmem:[#allocation3 + $0x10] sm:$0xff] }
 0x64a   : > { %v1818_v60 = vsel %vm1448_vm5, %v1813_v58, %v1815_v37  ;;  %v1839_v61 = vsel %vm4152_vm13, %v1835_v24, %v1837_v59  ;;  %1845 = vst.msk [vmem:[#allocation3 + $0x58] sm:$0xf0] %vm1353_vm15, %v1837_v59  ;;  %v1866_v5 = vld [vmem:[#allocation3 + $0x8] sm:$0xff]  ;;  %vm4157_vm15 = vmmov 0   ;;  %vm4161_vm5 = vcmp.eq.s32.totalorder %v3547_v23, 2 }
 0x64b   : > { %1823 = vst [vmem:[#allocation3 + $0x48] sm:$0xf] %v1818_v60  ;;  %1844 = vst [vmem:[#allocation3 + $0x50] sm:$0xf0] %v1839_v61  ;;  %vm2148_vm13 = vcmask 146432  }
 0x64d   : > { %v1854_v62 = vpop.permute.xlu0 %1853  ;;  %v1833_v63 = vpop.permute.xlu1 %1832  ;;  %v1870_v17 = vld [vmem:[#allocation3 + $0x28] sm:$0xff]  ;;  %v1873_v14 = vld [vmem:[#allocation3 + $0x40] sm:$0xff] }
 0x64e   : > { %v1838_v3 = vsel %vm4153_vm1, %v1833_v63, %v1835_v24  ;;  %v1869_v6 = vld [vmem:[#allocation3 + $0x20] sm:$0xff]  ;;  %v1872_v55 = vld [vmem:[#allocation3 + $0x38] sm:$0xff]  ;;  %v3057_v53 = vpack.c.bf16 %v1870_v17, %v1867_v30  ;;  %vm2134_vm1 = vcmp.eq.s32.totalorder %v3547_v23, 7 }
 0x64f   : > { %1843 = vst [vmem:[#allocation3 + $0x48] sm:$0xf0] %v1838_v3  ;;  %v3048_v7 = vpack.c.bf16 %v1869_v6, %v1866_v5 }
 0x651   : > { %v1852_v52 = vpop.permute.xlu0 %1851  ;;  %v1856_v9 = vpop.permute.xlu1 %1855  ;;  %3049 = vmatprep.subr.bf16.mxu0 %v3048_v7  ;;  %v1876_v20 = vld [vmem:[#allocation3 + $0x58] sm:$0xff] }
 0x652   : > { %v1857_v10 = vsel %vm4154_vm14, %v1852_v52, %v1854_v62  ;;  %v1858_v11 = vsel %vm4155_vm6, %v1854_v62, %v1856_v9  ;;  %1864 = vst.msk [vmem:[#allocation3 + $0x70] sm:$0xf] %vm997_vm3, %v1856_v9  ;;  %3051 = vmatpush1.bf16.msra.mxu0 %v3050_v8  ;;  %v1875_v57 = vld [vmem:[#allocation3 + $0x50] sm:$0xff]  ;;  %vm4156_vm3 = vcmask 293888   ;;  %v3060_v21 = vpack.c.bf16 %v1876_v20, %v1873_v14 }
 0x653   : > { %1862 = vst [vmem:[#allocation3 + $0x60] sm:$0xf] %v1857_v10  ;;  %1863 = vst [vmem:[#allocation3 + $0x68] sm:$0xf] %v1858_v11  ;;  %v3052_v4 = vpack.c.bf16 %v1875_v57, %v1872_v55  ;;  %v3875_v55 = vadd.s32 8, %v3547_v23 }
 0x654   : > { %vm4158_vm7 = vmmov %vm4156_vm3 }
 0x655   : > { %3053 = vmatprep.subr.bf16.mxu0 %v3052_v4  ;;  %vm2156_vm14 = vcmp.eq.s32.totalorder %v3875_v55, 8  ;;  %vm2168_vm6 = vcmp.eq.s32.totalorder %v3875_v55, 9 }
 0x656   : > { %v1874_v13 = vld [vmem:[#allocation3 + $0x48] sm:$0xff] }
 0x657   : > { %v3054_v15 = vpack.c.bf16 %v1874_v13, %v1871_v12 }
 0x659   : > { %3055 = vmatpush1.bf16.msra.mxu0 %v3054_v15  ;;  %v1879_v24 = vld [vmem:[#allocation3 + $0x70] sm:$0xf] }
 0x65a   : > { %v1878_v16 = vld [vmem:[#allocation3 + $0x68] sm:$0xf]  ;;  %v1877_v19 = vld [vmem:[#allocation3 + $0x60] sm:$0xf] }
 0x65b   : > { %2747 = vmatprep.subr.msk.mxu0 %vm993_vm2, %v1878_v16 }
 0x65d   : > { %2748 = vmatpush1.msk.msra.mxu0 %vm993_vm2, %v1877_v19 }
 0x65e   : > { %2749 = vmatmul.mubr.msk.f32.vlgmr.msra.gmra.mrb[10].mxu0 %vm4156_vm3, %v1684_v18  ;;  %3056 = vmatprep.subr.bf16.mxu0 %v3227_v1  ;;  %vm2180_vm3 = vcmp.eq.s32.totalorder %v3875_v55, 10 }
 0x65f   : > { %3058 = vmatpush3.bf16.msra.mxu0 %v3057_v53  ;;  %2971 = vmatprep.mubr.msk.f32.mxu0 %vm4157_vm15, %v3229_v2  ;;  %vm2192_vm15 = vcmp.eq.s32.totalorder %v3875_v55, 11 }
 0x660   : > { %3059 = vmatprep.subr.bf16.mxu0 %v3227_v1 }
 0x662   : > { %v1883_v25 = vpop.permute.xlu1 %1882 }
 0x663   : > { %3061 = vmatpush3.bf16.msra.mxu0 %v3060_v21  ;;  %v1888_v27 = vrot.slane %v1883_v25, %v3553_v28 }
 0x664   : > { %2969 = vmatprep.subr.mxu0 %v3229_v2 }
 0x666   : > { %v2065_v26 = vpop.permute.xlu1 %2064 }
 0x667   : > { %2970 = vmatpush3.msk.msra.mxu0 %vm993_vm2, %v1879_v24  ;;  %2075 = vrot.lane.b32.xlu1 %v2065_v26, %s3245_s28  ;;  %vm4159_vm2 = vcmp.eq.s32.totalorder %v3547_v23, 0 }
 0x668   : > { %2972 = vmatmul.mubr.msk.f32.vlgmr.msra.gmra.mrb[12].mxu0 %vm4158_vm7, %v1684_v18  ;;  %vm2204_vm7 = vcmp.eq.s32.totalorder %v3875_v55, 12 }
 0x6d9   : > { %v2076_v35 = vpop.permute.xlu1 %2075 }
 0x6da   : > { %2086 = vrot.lane.b32.xlu1 %v2076_v35, %s3245_s28 }
 0x731   : > { %v1967_v29 = vpop.f32.mrb[10].mxu0 }
 0x732   : > { %v1968_v32 = vadd.f32 %v1967_v29, %v1888_v27  ;;  %v1969_v33 = vpop.f32.mrb[11].mxu0 }
 0x733   : > { %v1970_v1 = vadd.f32 %v1969_v33, %v1888_v27 }
 0x734   : > { %vm2042_vm11 = vcmp.gt.f32.partialorder %v1968_v32, 0.0  ;;  %v2045_v34 = vmul.f32 0.1, %v1968_v32 }
 0x735   : > { %v2046_v63 = vmul.f32 0.1, %v1970_v1  ;;  %vm2043_vm9 = vcmp.gt.f32.partialorder %v1970_v1, 0.0 }
 0x736   : > { %v2048_v36 = vsel %vm2042_vm11, %v1968_v32, %v2045_v34 }
 0x737   : > { %v2056_v37 = vrot.slane %v2048_v36, %v3553_v28  ;;  %v2049_v0 = vsel %vm2043_vm9, %v1970_v1, %v2046_v63  ;;  %v2266_v36 = vand.u32 127, %v928_v22  ;;  %v3246_v22 = vmov 1.0|1.0  }
 0x738   : > { %v2121_v3 = vrot.slane %v2049_v0, %v3553_v28  ;;  %v3926_v63 = vsub.s32 6, %v3547_v23  ;;  %v3929_v0 = vsub.s32 7, %v3547_v23 }
 0x739   : > { %v2057_v38 = vsel %vm4159_vm2, %v2056_v37, 0.0  ;;  %vm2216_vm2 = vcmp.eq.s32.totalorder %v3875_v55, 13 }
 0x73a   : > { %2062 = vrot.lane.b32.xlu0 %v2057_v38, %s3245_s28  ;;  %v2269_v38 = vmul.u32 16, %v3875_v55 }
 0x73b   : > { %v2038_v39 = vpop.f32.mrb[12].mxu0 }
 0x73c   : > { %v3848_v41 = vadd.f32 %v2038_v39, %v1888_v27  ;;  %v2973_v42 = vpop.f32.mrb[13].mxu0  ;;  %v2267_v39 = vadd.s32 128, %v2266_v36 }
 0x73d   : > { %v2275_v42 = vadd.s32 16, %v2269_v38 }
 0x73e   : > { %v2047_v27 = vmul.f32 0.1, %v3848_v41  ;;  %vm2044_vm11 = vcmp.gt.f32.partialorder %v3848_v41, 0.0 }
 0x740   : > { %v2050_v29 = vsel %vm2044_vm11, %v3848_v41, %v2047_v27 }
 0x741   : > { %v2220_v1 = vrot.slane %v2050_v29, %v3553_v28 }
 0x74c   : > { %v2087_v44 = vpop.permute.xlu1 %2086 }
 0x74d   : > { %2098 = vrot.lane.b32.xlu1 %v2087_v44, %s3245_s28 }
 0x7ac   : > { %v2063_v45 = vpop.permute.xlu0 %2062 }
 0x7ad   : > { %v2068_v47 = vsel %vm4160_vm4, %v2056_v37, %v2063_v45 }
 0x7ae   : > { %2073 = vrot.lane.b32.xlu0 %v2068_v47, %s3245_s28 }
 0x7bf   : > { %v2099_v31 = vpop.permute.xlu1 %2098 }
 0x820   : > { %v2074_v48 = vpop.permute.xlu0 %2073 }
 0x821   : > { %v2079_v49 = vsel %vm4161_vm5, %v2056_v37, %v2074_v48  ;;  %vm2273_vm5 = vcmp.ge.s32.totalorder %v2267_v39, %v2269_v38 }
 0x822   : > { %2084 = vrot.lane.b32.xlu0 %v2079_v49, %s3245_s28 }
 0x894   : > { %v2085_v50 = vpop.permute.xlu0 %2084 }
 0x895   : > { %v2090_v40 = vsel %vm4162_vm12, %v2056_v37, %v2085_v50 }
 0x896   : > { %2096 = vrot.lane.b32.xlu0 %v2090_v40, %s3245_s28 }
 0x89a   : > { %2110 = vrot.lane.b32.xlu0 %v2099_v31, %s3245_s28 }
 0x908   : > { %v2097_v54 = vpop.permute.xlu0 %2096 }
 0x909   : > { %v2102_v56 = vsel %vm2092_vm0, %v2056_v37, %v2097_v54  ;;  %vm2279_vm0 = vcmp.lt.s32.totalorder %v2267_v39, %v2275_v42 }
 0x90a   : > { %2108 = vrot.lane.b32.xlu1 %v2102_v56, %s3245_s28 }
 0x90c   : > { %v2111_v58 = vpop.permute.xlu0 %2110 }
 0x90d   : > { %2126 = vrot.lane.b32.xlu0 %v2111_v58, %s3245_s28 }
 0x97c   : > { %v2109_v59 = vpop.permute.xlu1 %2108 }
 0x97d   : > { %v2114_v60 = vsel %vm2104_vm8, %v2056_v37, %v2109_v59 }
 0x97e   : > { %2124 = vrot.lane.b32.xlu1 %v2114_v60, %s3245_s28  ;;  %v3917_v60 = vsub.s32 3, %v3547_v23 }
 0x97f   : > { %v2127_v61 = vpop.permute.xlu0 %2126 }
 0x980   : > { %v3142_v62 = vpack.i.bf16 %v2127_v61, %v2127_v61  ;;  %v3920_v61 = vsub.s32 4, %v3547_v23 }
 0x982   : > { %3143 = vrot.lane.b32.xlu0 %v3142_v62, %s3245_s28  ;;  %v3923_v62 = vsub.s32 5, %v3547_v23 }
 0x9f0   : > { %v2125_v5 = vpop.permute.xlu1 %2124 }
 0x9f1   : > { %v2130_v6 = vsel %vm2116_vm10, %v2056_v37, %v2125_v5  ;;  %v2131_v7 = vsel %vm2116_vm10, %v2121_v3, %v2125_v5  ;;  %v2268_v37 = vmul.u32 16, %v3547_v23 }
 0x9f2   : > { %2140 = vrot.lane.b32.xlu1 %v2130_v6, %s3245_s28  ;;  %2142 = vrot.lane.b32.xlu0 %v2131_v7, %s3245_s28 }
 0x9f3   : > { %v2274_v41 = vadd.s32 16, %v2268_v37  ;;  %vm2271_vm4 = vcmp.ge.s32.totalorder %v2267_v39, %v2268_v37  ;;  %vm2270_vm9 = vcmp.ge.s32.totalorder %v2266_v36, %v2268_v37 }
 0x9f4   : > { %v3144_v51 = vpop.permute.xlu0 %3143 }
 0x9f5   : > { %v3146_v8 = vunpack.i.h.bf16 %v3144_v51  ;;  %v3145_v52 = vunpack.i.l.bf16 %v3144_v51  ;;  %vm2277_vm12 = vcmp.lt.s32.totalorder %v2267_v39, %v2274_v41  ;;  %vm2276_vm10 = vcmp.lt.s32.totalorder %v2266_v36, %v2274_v41 }
 0x9f6   : > { %vm2281_vm8 = vmand %vm2271_vm4, %vm2277_vm12  ;;  %vm2254_vm4 = vcmp.eq.s32.totalorder %v3875_v55, 15 }
 0x9f7   : > { %v2150_v9 = vsel %vm2148_vm13, %v3145_v52, %v3146_v8 }
 0x9f8   : > { %2161 = vrot.lane.b32.xlu1 %v2150_v9, %s3245_s28 }
 0xa64   : > { %v2141_v10 = vpop.permute.xlu1 %2140  ;;  %v2143_v11 = vpop.permute.xlu0 %2142 }
 0xa65   : > { %v2149_v57 = vsel %vm2148_vm13, %v2141_v10, %v2143_v11 }
 0xa66   : > { %v2153_v4 = vsel %vm2134_vm1, %v2121_v3, %v2149_v57  ;;  %vm2283_vm1 = vmand %vm2273_vm5, %vm2279_vm0  ;;  %vm2298_vm5 = vcmask 130048  }
 0xa67   : > { %2159 = vrot.lane.b32.xlu0 %v2153_v4, %s3245_s28 }
 0xa6a   : > { %v2162_v12 = vpop.permute.xlu1 %2161 }
 0xa6b   : > { %v2166_v13 = vsel %vm2156_vm14, %v2121_v3, %v2162_v12  ;;  %vm2272_vm14 = vcmp.ge.s32.totalorder %v2266_v36, %v2269_v38 }
 0xa6c   : > { %2173 = vrot.lane.b32.xlu1 %v2166_v13, %s3245_s28 }
 0xad9   : > { %v2160_v15 = vpop.permute.xlu0 %2159 }
 0xada   : > { %2171 = vrot.lane.b32.xlu0 %v2160_v15, %s3245_s28 }
 0xade   : > { %v2174_v16 = vpop.permute.xlu1 %2173 }
 0xadf   : > { %v2178_v17 = vsel %vm2168_vm6, %v2121_v3, %v2174_v16  ;;  %vm2278_vm6 = vcmp.lt.s32.totalorder %v2266_v36, %v2275_v42 }
 0xae0   : > { %2185 = vrot.lane.b32.xlu1 %v2178_v17, %s3245_s28  ;;  %vm2282_vm11 = vmand %vm2272_vm14, %vm2278_vm6 }
 0xb4c   : > { %v2172_v18 = vpop.permute.xlu0 %2171 }
 0xb4d   : > { %2183 = vrot.lane.b32.xlu0 %v2172_v18, %s3245_s28 }
 0xb52   : > { %v2186_v19 = vpop.permute.xlu1 %2185 }
 0xb53   : > { %v2190_v30 = vsel %vm2180_vm3, %v2121_v3, %v2186_v19  ;;  %vm3062_vm3 = vmpackc.low %vm2283_vm1, %vm2281_vm8 }
 0xb54   : > { %2197 = vrot.lane.b32.xlu1 %v2190_v30, %s3245_s28  ;;  %3063 = vmatprep.subr.msk.bf16.mxu1 %vm3062_vm3, %v3246_v22 }
 0xbbf   : > { %v2184_v53 = vpop.permute.xlu0 %2183 }
 0xbc0   : > { %2195 = vrot.lane.b32.xlu0 %v2184_v53, %s3245_s28 }
 0xbc6   : > { %v2198_v20 = vpop.permute.xlu1 %2197 }
 0xbc7   : > { %v2202_v14 = vsel %vm2192_vm15, %v2121_v3, %v2198_v20  ;;  %vm2234_vm15 = vcmp.eq.s32.totalorder %v3875_v55, 14 }
 0xbc8   : > { %2209 = vrot.lane.b32.xlu0 %v2202_v14, %s3245_s28 }
 0xc32   : > { %v2196_v21 = vpop.permute.xlu0 %2195 }
 0xc33   : > { %2207 = vrot.lane.b32.xlu1 %v2196_v21, %s3245_s28 }
 0xc3a   : > { %v2210_v24 = vpop.permute.xlu0 %2209 }
 0xc3b   : > { %v2214_v25 = vsel %vm2204_vm7, %v2121_v3, %v2210_v24  ;;  %vm2280_vm7 = vmand %vm2270_vm9, %vm2276_vm10 }
 0xc3c   : > { %2225 = vrot.lane.b32.xlu0 %v2214_v25, %s3245_s28 }
 0xca5   : > { %v2208_v26 = vpop.permute.xlu1 %2207 }
 0xca6   : > { %2223 = vrot.lane.b32.xlu1 %v2208_v26, %s3245_s28 }
 0xcae   : > { %v2226_v33 = vpop.permute.xlu0 %2225 }
 0xcaf   : > { %v2232_v34 = vsel %vm2216_vm2, %v2220_v1, %v2226_v33  ;;  %v2231_v35 = vsel %vm2216_vm2, %v2121_v3, %v2226_v33  ;;  %vm3064_vm2 = vmpackc.low %vm2282_vm11, %vm2280_vm7 }
 0xcb0   : > { %3065 = vmatpush1.bf16.msk.msra.mxu1 %vm3064_vm2, %v3246_v22 }
 0xd18   : > { %v2224_v32 = vpop.permute.xlu1 %2223 }
 0xd19   : > { %2241 = vrot.lane.b32.xlu0 %v2224_v32, %s3245_s28  ;;  %2239 = vrot.lane.b32.xlu1 %v2224_v32, %s3245_s28 }
 0xd1d   : > { %2245 = vrot.lane.b32.xlu0 %v2232_v34, %s3245_s28  ;;  %2243 = vrot.lane.b32.xlu1 %v2231_v35, %s3245_s28 }
 0xd8b   : > { %v2242_v44 = vpop.permute.xlu0 %2241  ;;  %v2240_v45 = vpop.permute.xlu1 %2239 }
 0xd8c   : > { %v2247_v47 = vsel %vm2148_vm13, %v2240_v45, %v2242_v44 }
 0xd8d   : > { %2257 = vrot.lane.b32.xlu1 %v2247_v47, %s3245_s28 }
 0xd8f   : > { %v2246_v48 = vpop.permute.xlu0 %2245  ;;  %v2244_v49 = vpop.permute.xlu1 %2243 }
 0xd90   : > { %v2248_v50 = vsel %vm2148_vm13, %v2244_v49, %v2246_v48 }
 0xd91   : > { %v2252_v40 = vsel %vm2234_vm15, %v2220_v1, %v2248_v50 }
 0xd92   : > { %2259 = vrot.lane.b32.xlu0 %v2252_v40, %s3245_s28  ;;  %s4040_s28 = scalar_lea.sflag [#allocation6], %s476_s22 }
 0xdff   : > { %v2258_v31 = vpop.permute.xlu1 %2257 }
 0xe00   : > { %2294 = vrot.lane.b32.xlu1 %v2258_v31, %s3247_s29 }
 0xe04   : > { %v2260_v54 = vpop.permute.xlu0 %2259 }
 0xe05   : > { %v2264_v56 = vsel %vm2254_vm4, %v2220_v1, %v2260_v54 }
 0xe06   : > { %2296 = vrot.lane.b32.xlu0 %v2264_v56, %s3247_s29  ;;  %s3167_s29 = sshll.u32 %s3248_s30, 4  ;;  %s3168_s29 = int_to_ptr.vmem [resolvable:$false] %s3167_s29 }
 0xe07   : > { %s3169_s4 = scalar_lea.vmem %s3168_s29, 16384  ;;  %p3170_p0 = scmp.lt.s32.totalorder %s4008_s26, %s3168_s29 }
 0xe08   : > { %p3171_p1 = scmp.lt.s32.totalorder %s3169_s4, %s3163_s23 }
 0xe0a   : > { %p3172_p2 = por %p3171_p1, %p3170_p0 }
 0xe0c   : > { %p3173_p3 = pnand %p3172_p2, %p3166_p13 }
 0xe72   : > { %v2295_v58 = vpop.permute.xlu1 %2294 }
 0xe73   : > { %2760 = vmatmul.mubr.msk.f32.vlgmr.msra.gmra.mrb[2].mxu1 %vm2298_vm5, %v2295_v58 }
 0xe74   : > { %2373 = vmatprep.mubr.f32.mxu1 %v3229_v2 }
 0xe78   : > { %v2297_v59 = vpop.permute.xlu0 %2296 }
 0xe79   : > { %2761 = vmatmul.mubr.msk.f32.gmra.mrb[4].mxu1 %vm2298_vm5, %v2297_v59 }
 0xf46   : > { %v2369_v2 = vpop.f32.mrb[2].mxu1 }
 0xf47   : > { %v2383_v3 = vrot.slane %v2369_v2, %v3553_v28  ;;  %v2395_v5 = vrot.slane %v2369_v2, %v3565_v43  ;;  %v2407_v6 = vrot.slane %v2369_v2, %v3570_v46  ;;  %v2419_v7 = vrot.slane %v2369_v2, %v3917_v60  ;;  %v2371_v51 = vpop.f32.mrb[3].mxu1 }
 0xf48   : > { %v2431_v8 = vrot.slane %v2369_v2, %v3920_v61  ;;  %v2443_v52 = vrot.slane %v2369_v2, %v3923_v62  ;;  %v2455_v9 = vrot.slane %v2369_v2, %v3926_v63  ;;  %v2467_v10 = vrot.slane %v2369_v2, %v3929_v0 }
 0xf49   : > { %2388 = vst [vmem:[%s3939_s17] sm:$0xff] %v2383_v3  ;;  %2390 = vst [vmem:[%s3939_s17 + $0x10] sm:$0xff] %v2383_v3  ;;  %v2387_v23 = vrot.slane %v2371_v51, %v3553_v28  ;;  %v2399_v11 = vrot.slane %v2371_v51, %v3565_v43  ;;  %v2411_v55 = vrot.slane %v2371_v51, %v3570_v46 }
 0xf4a   : > { %2400 = vst [vmem:[%s3939_s17 + $0x20] sm:$0xff] %v2395_v5  ;;  %2402 = vst [vmem:[%s3939_s17 + $0x30] sm:$0xff] %v2395_v5  ;;  %v2423_v57 = vrot.slane %v2371_v51, %v3917_v60  ;;  %v2435_v4 = vrot.slane %v2371_v51, %v3920_v61  ;;  %v2447_v12 = vrot.slane %v2371_v51, %v3923_v62 }
 0xf4b   : > { %2412 = vst [vmem:[%s3939_s17 + $0x40] sm:$0xff] %v2407_v6  ;;  %2414 = vst [vmem:[%s3939_s17 + $0x50] sm:$0xff] %v2407_v6  ;;  %v2459_v13 = vrot.slane %v2371_v51, %v3926_v63  ;;  %v2471_v15 = vrot.slane %v2371_v51, %v3929_v0 }
 0xf4c   : > { %2424 = vst [vmem:[%s3939_s17 + $0x60] sm:$0xff] %v2419_v7  ;;  %2426 = vst [vmem:[%s3939_s17 + $0x70] sm:$0xff] %v2419_v7  ;;  %v2375_v16 = vpop.f32.mrb[4].mxu1 }
 0xf4d   : > { %2436 = vst [vmem:[%s3939_s17 + $0x80] sm:$0xff] %v2431_v8  ;;  %2438 = vst [vmem:[%s3939_s17 + $0x90] sm:$0xff] %v2431_v8  ;;  %v2479_v17 = vrot.slane %v2375_v16, %v3553_v28  ;;  %v2491_v18 = vrot.slane %v2375_v16, %v3565_v43  ;;  %v2503_v19 = vrot.slane %v2375_v16, %v3570_v46  ;;  %v2377_v53 = vpop.f32.mrb[5].mxu1 }
 0xf4e   : > { %2448 = vst [vmem:[%s3939_s17 + $0xa0] sm:$0xff] %v2443_v52  ;;  %2450 = vst [vmem:[%s3939_s17 + $0xb0] sm:$0xff] %v2443_v52  ;;  %v2515_v30 = vrot.slane %v2375_v16, %v3917_v60  ;;  %v2527_v20 = vrot.slane %v2375_v16, %v3920_v61  ;;  %v2539_v14 = vrot.slane %v2375_v16, %v3923_v62 }
 0xf4f   : > { %2460 = vst [vmem:[%s3939_s17 + $0xc0] sm:$0xff] %v2455_v9  ;;  %2462 = vst [vmem:[%s3939_s17 + $0xd0] sm:$0xff] %v2455_v9  ;;  %v2551_v21 = vrot.slane %v2375_v16, %v3926_v63  ;;  %v2563_v24 = vrot.slane %v2375_v16, %v3929_v0  ;;  %v2483_v25 = vrot.slane %v2377_v53, %v3553_v28 }
 0xf50   : > { %2472 = vst [vmem:[%s3939_s17 + $0xe0] sm:$0xff] %v2467_v10  ;;  %2474 = vst [vmem:[%s3939_s17 + $0xf0] sm:$0xff] %v2467_v10  ;;  %v2495_v26 = vrot.slane %v2377_v53, %v3565_v43  ;;  %v2507_v27 = vrot.slane %v2377_v53, %v3570_v46  ;;  %v2519_v29 = vrot.slane %v2377_v53, %v3917_v60 }
 0xf51   : > { %2389 = vst [vmem:[%s3939_s17 + $0x8] sm:$0xff] %v2387_v23  ;;  %2391 = vst [vmem:[%s3939_s17 + $0x18] sm:$0xff] %v2387_v23  ;;  %v2531_v28 = vrot.slane %v2377_v53, %v3920_v61  ;;  %v2543_v43 = vrot.slane %v2377_v53, %v3923_v62  ;;  %v2555_v46 = vrot.slane %v2377_v53, %v3926_v63 }
 0xf52   : > { %2401 = vst [vmem:[%s3939_s17 + $0x28] sm:$0xff] %v2399_v11  ;;  %2403 = vst [vmem:[%s3939_s17 + $0x38] sm:$0xff] %v2399_v11  ;;  %v2567_v32 = vrot.slane %v2377_v53, %v3929_v0 }
 0xf53   : > { %2413 = vst [vmem:[%s3939_s17 + $0x48] sm:$0xff] %v2411_v55  ;;  %2415 = vst [vmem:[%s3939_s17 + $0x58] sm:$0xff] %v2411_v55 }
 0xf54   : > { %2425 = vst [vmem:[%s3939_s17 + $0x68] sm:$0xff] %v2423_v57  ;;  %2427 = vst [vmem:[%s3939_s17 + $0x78] sm:$0xff] %v2423_v57 }
 0xf55   : > { %2437 = vst [vmem:[%s3939_s17 + $0x88] sm:$0xff] %v2435_v4  ;;  %2439 = vst [vmem:[%s3939_s17 + $0x98] sm:$0xff] %v2435_v4 }
 0xf56   : > { %2449 = vst [vmem:[%s3939_s17 + $0xa8] sm:$0xff] %v2447_v12  ;;  %2451 = vst [vmem:[%s3939_s17 + $0xb8] sm:$0xff] %v2447_v12 }
 0xf57   : > { %2461 = vst [vmem:[%s3939_s17 + $0xc8] sm:$0xff] %v2459_v13  ;;  %2463 = vst [vmem:[%s3939_s17 + $0xd8] sm:$0xff] %v2459_v13 }
 0xf58   : > { %2473 = vst [vmem:[%s3939_s17 + $0xe8] sm:$0xff] %v2471_v15  ;;  %2475 = vst [vmem:[%s3939_s17 + $0xf8] sm:$0xff] %v2471_v15 }
 0xf59   : > { %2484 = vst [vmem:[%s3939_s17 + $0x100] sm:$0xff] %v2479_v17  ;;  %2486 = vst [vmem:[%s3939_s17 + $0x110] sm:$0xff] %v2479_v17 }
 0xf5a   : > { %2496 = vst [vmem:[%s3939_s17 + $0x120] sm:$0xff] %v2491_v18  ;;  %2498 = vst [vmem:[%s3939_s17 + $0x130] sm:$0xff] %v2491_v18 }
 0xf5b   : > { %2508 = vst [vmem:[%s3939_s17 + $0x140] sm:$0xff] %v2503_v19  ;;  %2510 = vst [vmem:[%s3939_s17 + $0x150] sm:$0xff] %v2503_v19 }
 0xf5c   : > { %2520 = vst [vmem:[%s3939_s17 + $0x160] sm:$0xff] %v2515_v30  ;;  %2522 = vst [vmem:[%s3939_s17 + $0x170] sm:$0xff] %v2515_v30 }
 0xf5d   : > { %2532 = vst [vmem:[%s3939_s17 + $0x180] sm:$0xff] %v2527_v20  ;;  %2534 = vst [vmem:[%s3939_s17 + $0x190] sm:$0xff] %v2527_v20 }
 0xf5e   : > { %2544 = vst [vmem:[%s3939_s17 + $0x1a0] sm:$0xff] %v2539_v14  ;;  %2546 = vst [vmem:[%s3939_s17 + $0x1b0] sm:$0xff] %v2539_v14 }
 0xf5f   : > { %2556 = vst [vmem:[%s3939_s17 + $0x1c0] sm:$0xff] %v2551_v21  ;;  %2558 = vst [vmem:[%s3939_s17 + $0x1d0] sm:$0xff] %v2551_v21 }
 0xf60   : > { %2568 = vst [vmem:[%s3939_s17 + $0x1e0] sm:$0xff] %v2563_v24  ;;  %2570 = vst [vmem:[%s3939_s17 + $0x1f0] sm:$0xff] %v2563_v24 }
 0xf61   : > { %2485 = vst [vmem:[%s3939_s17 + $0x108] sm:$0xff] %v2483_v25  ;;  %2487 = vst [vmem:[%s3939_s17 + $0x118] sm:$0xff] %v2483_v25 }
 0xf62   : > { %2497 = vst [vmem:[%s3939_s17 + $0x128] sm:$0xff] %v2495_v26  ;;  %2499 = vst [vmem:[%s3939_s17 + $0x138] sm:$0xff] %v2495_v26 }
 0xf63   : > { %2509 = vst [vmem:[%s3939_s17 + $0x148] sm:$0xff] %v2507_v27  ;;  %2511 = vst [vmem:[%s3939_s17 + $0x158] sm:$0xff] %v2507_v27 }
 0xf64   : > { %2521 = vst [vmem:[%s3939_s17 + $0x168] sm:$0xff] %v2519_v29  ;;  %2523 = vst [vmem:[%s3939_s17 + $0x178] sm:$0xff] %v2519_v29 }
 0xf65   : > { %2533 = vst [vmem:[%s3939_s17 + $0x188] sm:$0xff] %v2531_v28  ;;  %2535 = vst [vmem:[%s3939_s17 + $0x198] sm:$0xff] %v2531_v28 }
 0xf66   : > { %2545 = vst [vmem:[%s3939_s17 + $0x1a8] sm:$0xff] %v2543_v43  ;;  %2547 = vst [vmem:[%s3939_s17 + $0x1b8] sm:$0xff] %v2543_v43 }
 0xf67   : > { %2557 = vst [vmem:[%s3939_s17 + $0x1c8] sm:$0xff] %v2555_v46  ;;  %2559 = vst [vmem:[%s3939_s17 + $0x1d8] sm:$0xff] %v2555_v46 }
 0xf68   : > { %2569 = vst [vmem:[%s3939_s17 + $0x1e8] sm:$0xff] %v2567_v32  ;;  %2571 = vst [vmem:[%s3939_s17 + $0x1f8] sm:$0xff] %v2567_v32 }
 0xf69   : > { %3176 = shalt.err (!%p3173_p3)
}
 0xf6a   : > { %s3177_s22 = scalar_lea.hbm %s4006_s27, 8192  ;;  %s3181_s12 = scalar_lea.hbm %s4094_s13, 16384 }
 0xf6b   : > { %p3178_p4 = scmp.ne.s32.totalorder %s4006_s27, %s3177_s22  ;;  %p3182_p9 = scmp.lt.u32.totalorder %s4006_s27, %s4094_s13 }
 0xf6c   : > { %p3183_p10 = scmp.lt.u32.totalorder %s3181_s12, %s3177_s22  ;;  %p3185_p12 = scmp.lt.u32.totalorder %s3177_s22, %s4006_s27 }
 0xf6d   : > { %p3179_p7 = pnand %p3178_p4, %p3367_p5 }
 0xf6e   : > { %p3184_p11 = por %p3183_p10, %p3182_p9 }
 0xf6f   : > { %p3180_p8 = pneg %p3179_p7 }
 0xf70   : > { %p3186_p13 = por %p3185_p12, %p3184_p11 }
 0xf72   : > { %p3187_p0 = pnand %p3186_p13, %p3180_p8 }
 0xf74   : > { %3190 = shalt.err (!%p3187_p0)
}
 0xf75   : > { %s3249_s23 = smov 256   ;;  %s3250_s29 = smov 16  }
 0xf76   : > { %3078 = dma.vmem_to_hbm [thread:$0]  (%p3367_p5), %s4008_s26, 8192, %s4006_s27, %s4040_s28, %s3249_s23, %s3249_s23, %s3250_s29  }
 0xf77 PF: > { %p3084_p1 = scmp.ge.s32.totalorder %s3225_s18, 2  ;;  %s2609_s4 = sand.u32 1, %s3213_s15  }
 0xf78   : > { %s2610_s22 = scalar_lea.sflag [#allocation6], %s2609_s4 }
 0xf79   : > { %p3081_p2 = pnand %p3084_p1, %p3371_p6 }
 0xf7b   : > { %3208 = dma.done.wait (!%p3081_p2), %s2610_s22, 8192  }
 0xf7c   : > { %3210 = vsyncadd (!%p3081_p2), %s2610_s22, 4294959104  ;;  %s4163_s17 = sld [smem:[#allocation8_spill]]  ;;  %s4164_s19 = sld [smem:[#allocation9_spill]] }
 0xf7d   : > { %p27_p3 = scmp.ge.s32.totalorder %s3354_s20, 4   ;;  %s4165_s15 = smov %s3217_s16 }
 0xf7e   : > { %s4168_s18 = smov %s3354_s20 }
 0xf7f   :  { %29 = sbr.rel (!%p27_p3) target bundleno = 6 (0x6), region = 125 }
 0xf82   : > { %s4166_s16 = smov %s4163_s17  ;;  %s4167_s17 = smov %s4164_s19 }
 0xf86   :  { %2623 = vsyncpa [#allocation6], 1 }
 0xf87   :  { %2625 = vsyncpa [#allocation6 + $0x1], 1 }

</bundles_post_ra>
